<compile_context>
chip_gen: v7x
topology: tpu7x:2x2x1
jax: 0.10.0
libtpu: 0.0.40
codegen_flags: <defaults>
</compile_context>

<pallas_src>
import jax
import jax.numpy as jnp
from jax.experimental import pallas as pl
from jax.experimental.pallas import tpu as pltpu

TILE_N = 512          # node tile: transform rows, propagate dst & src, pool reduction
VMEM_LIMIT = 32 << 20


# ------------------------------- kernels -------------------------------------
def transform_kernel(h_ref, degw_ref, wcat_ref, bcat_ref, alin_ref, rest_ref):
    """Fused LEConv linears for one tile of nodes (bf16 MXU matmul, f32 accumulate).

    z    = h @ [W1|W2|W3] + [b1|0|b3]     (single wide matmul)
    alin = z1                             (bf16 operand of the A @ alin contraction)
    rest = z3 - degw * z2                 (f32 per-dst-node part of LEConv)
    """
    hp = alin_ref.shape[1]
    z = jnp.dot(h_ref[...], wcat_ref[...],
                preferred_element_type=jnp.float32) + bcat_ref[...]
    alin_ref[...] = z[:, :hp].astype(alin_ref.dtype)
    rest_ref[...] = z[:, 2 * hp:] - degw_ref[...] * z[:, hp:2 * hp]


def propagate_kernel(start_ref, count_ref, a_ref, alin_ref, rest_ref, hout_ref, acc_ref):
    """h_out = relu(A @ alin + rest) over the non-empty src-tile band of each dst tile.

    start_ref/count_ref are scalar-prefetched per-dst-tile band descriptors; iterations
    with k >= count re-visit the same clamped block (no DMA) and skip the accumulate.
    """
    i = pl.program_id(0)
    k = pl.program_id(1)

    @pl.when(k == 0)
    def _():
        acc_ref[...] = rest_ref[...]

    @pl.when(k < count_ref[i])
    def _():
        acc_ref[...] += jnp.dot(a_ref[...], alin_ref[...],
                                preferred_element_type=jnp.float32)

    @pl.when(k == pl.num_programs(1) - 1)
    def _():
        hout_ref[...] = jnp.maximum(acc_ref[...], 0.0).astype(hout_ref.dtype)


def pool_mlp_kernel(onehot_ref, h_ref, invc_ref, wc1_ref, bc1_ref, wc2_ref, bc2_ref,
                    out_ref, g_acc):
    """global_mean_pool accumulated over node tiles, causal MLP on the last step."""
    k = pl.program_id(0)

    @pl.when(k == 0)
    def _():
        g_acc[...] = jnp.zeros_like(g_acc)

    g_acc[...] += jnp.dot(onehot_ref[...], h_ref[...],
                          preferred_element_type=jnp.float32)

    @pl.when(k == pl.num_programs(0) - 1)
    def _():
        g = g_acc[...] * invc_ref[...]
        hm = jnp.maximum(
            jnp.dot(g, wc1_ref[...], preferred_element_type=jnp.float32) + bc1_ref[...],
            0.0)
        out_ref[...] = (jnp.dot(hm, wc2_ref[...], preferred_element_type=jnp.float32)
                        + bc2_ref[...]).astype(out_ref.dtype)


# ------------------------------- wrapper --------------------------------------
def _round_up(x, m):
    return ((x + m - 1) // m) * m


def _pad2(a, rows, cols):
    a = jnp.asarray(a, jnp.float32)
    return jnp.zeros((rows, cols), jnp.float32).at[:a.shape[0], :a.shape[1]].set(a)


def spmotif_forward(x, edge_index, edge_attr, batch, params, num_graphs):
    n, in_c = x.shape
    hid = params["w_emb"].shape[1]
    num_unit = params["w1"].shape[0]
    num_classes = params["wc2"].shape[1]

    n_pad = _round_up(n, TILE_N)
    in_pad = _round_up(in_c, 128)
    hid_pad = _round_up(hid, 128)
    mid_pad = _round_up(params["wc1"].shape[1], 128)
    c_pad = _round_up(num_classes, 128)
    b_pad = _round_up(num_graphs, 8)
    n_tiles = n_pad // TILE_N

    # ---- graph glue: O(E) scatter ops with no clean tiled Pallas form ----
    src, dst = edge_index[0], edge_index[1]
    ew = edge_attr.astype(jnp.float32)

    # Per-dst-tile band of non-empty src tiles (block-sparsity of the batched graph).
    # TODO(synk): this concretizes max_k from edge_index, so the wrapper cannot sit under
    # jit as-is; under jit, fall back to max_k = n_tiles (dense band).
    dst_tile = dst // TILE_N
    src_tile = src // TILE_N
    mins = jnp.full((n_tiles,), n_tiles, jnp.int32).at[dst_tile].min(src_tile)
    maxs = jnp.full((n_tiles,), -1, jnp.int32).at[dst_tile].max(src_tile)
    src_count = jnp.where(maxs >= 0, maxs - mins + 1, 0).astype(jnp.int32)
    src_start = jnp.where(maxs >= 0, mins, 0).astype(jnp.int32)
    max_k = max(int(jnp.max(src_count)), 1)

    # Banded adjacency: only the (dst_tile, src_tile) blocks the kernel will visit.
    # A[dst, src] = sum of edge weights src -> dst; band row-block i*max_k + slot holds
    # the dst-tile-i block whose absolute src tile is src_start[i] + slot.
    k_slot = src_tile - src_start[dst_tile]
    band_row = (dst_tile * max_k + k_slot) * TILE_N + (dst % TILE_N)
    adj_band = (jnp.zeros((n_tiles * max_k * TILE_N, TILE_N), jnp.float32)
                .at[band_row, src % TILE_N].add(ew)).astype(jnp.bfloat16)
    degw = jnp.zeros((n_pad, 1), jnp.float32).at[dst, 0].add(ew)   # weighted in-degree

    # global_mean_pool glue (columns for padded nodes stay exactly zero).
    oh = (batch[None, :] == jnp.arange(b_pad, dtype=batch.dtype)[:, None]).astype(jnp.float32)
    onehot = jnp.zeros((b_pad, n_pad), jnp.bfloat16).at[:, :n].set(oh.astype(jnp.bfloat16))
    counts = oh.sum(axis=1, keepdims=True)
    inv_counts = 1.0 / jnp.maximum(counts, 1.0)

    x_p = _pad2(x, n_pad, in_pad).astype(jnp.bfloat16)

    # ---- fused / lane-padded weights (bf16 matmul operands, f32 biases) ----
    w_emb = _pad2(params["w_emb"], in_pad, hid_pad)
    b_emb = _pad2(params["b_emb"], 1, hid_pad)
    wcats, bcats = [], []
    for l in range(num_unit):
        w1 = _pad2(params["w1"][l], hid_pad, hid_pad)
        w2 = _pad2(params["w2"][l], hid_pad, hid_pad)
        w3 = _pad2(params["w3"][l], hid_pad, hid_pad)
        b1 = _pad2(params["b1"][l], 1, hid_pad)
        b3 = _pad2(params["b3"][l], 1, hid_pad)
        wcats.append(jnp.concatenate([w1, w2, w3], axis=1))          # [hid_pad, 3*hid_pad]
        bcats.append(jnp.concatenate(
            [b1, jnp.zeros((1, hid_pad), jnp.float32), b3], axis=1))
    # Fold node_emb Linear into the layer-0 fused transform (exact, no nonlinearity between):
    #   (x @ We + be) @ Wcat0 + bcat0 == x @ (We @ Wcat0) + (be @ Wcat0 + bcat0)
    bcats[0] = b_emb @ wcats[0] + bcats[0]
    wcats[0] = w_emb @ wcats[0]                                      # [in_pad, 3*hid_pad]
    wcats = [w.astype(jnp.bfloat16) for w in wcats]

    wc1 = _pad2(params["wc1"], hid_pad, mid_pad)
    bc1 = _pad2(params["bc1"], 1, mid_pad)
    wc2 = _pad2(params["wc2"], mid_pad, c_pad)
    bc2 = _pad2(params["bc2"], 1, c_pad)

    def run_transform(h_in, wcat, bcat):
        f_in = h_in.shape[1]
        return pl.pallas_call(
            transform_kernel,
            grid=(n_tiles,),
            in_specs=[
                pl.BlockSpec((TILE_N, f_in), lambda i: (i, 0)),
                pl.BlockSpec((TILE_N, 1), lambda i: (i, 0)),
                pl.BlockSpec((f_in, 3 * hid_pad), lambda i: (0, 0)),
                pl.BlockSpec((1, 3 * hid_pad), lambda i: (0, 0)),
            ],
            out_specs=(
                pl.BlockSpec((TILE_N, hid_pad), lambda i: (i, 0)),
                pl.BlockSpec((TILE_N, hid_pad), lambda i: (i, 0)),
            ),
            out_shape=(
                jax.ShapeDtypeStruct((n_pad, hid_pad), jnp.bfloat16),   # alin
                jax.ShapeDtypeStruct((n_pad, hid_pad), jnp.float32),    # rest
            ),
            compiler_params=pltpu.CompilerParams(
                dimension_semantics=("parallel",),
                vmem_limit_bytes=VMEM_LIMIT),
        )(h_in, degw, wcat, bcat)

    def run_propagate(alin, rest):
        def a_map(i, k, start_ref, count_ref):
            slot = jnp.minimum(k, jnp.maximum(count_ref[i] - 1, 0))
            return (i * max_k + slot, 0)

        def alin_map(i, k, start_ref, count_ref):
            slot = jnp.minimum(k, jnp.maximum(count_ref[i] - 1, 0))
            return (start_ref[i] + slot, 0)

        return pl.pallas_call(
            propagate_kernel,
            out_shape=jax.ShapeDtypeStruct((n_pad, hid_pad), jnp.bfloat16),
            grid_spec=pltpu.PrefetchScalarGridSpec(
                num_scalar_prefetch=2,
                grid=(n_tiles, max_k),
                in_specs=[
                    pl.BlockSpec((TILE_N, TILE_N), a_map),              # banded A tile
                    pl.BlockSpec((TILE_N, hid_pad), alin_map),          # alin src tile
                    pl.BlockSpec((TILE_N, hid_pad), lambda i, k, s, c: (i, 0)),  # rest
                ],
                out_specs=pl.BlockSpec((TILE_N, hid_pad), lambda i, k, s, c: (i, 0)),
                scratch_shapes=[pltpu.VMEM((TILE_N, hid_pad), jnp.float32)],
            ),
            compiler_params=pltpu.CompilerParams(
                dimension_semantics=("parallel", "arbitrary"),
                vmem_limit_bytes=VMEM_LIMIT),
        )(src_start, src_count, adj_band, alin, rest)

    h = x_p
    for l in range(num_unit):
        alin, rest = run_transform(h, wcats[l], bcats[l])
        h = run_propagate(alin, rest)

    out = pl.pallas_call(
        pool_mlp_kernel,
        grid=(n_tiles,),
        in_specs=[
            pl.BlockSpec((b_pad, TILE_N), lambda k: (0, k)),
            pl.BlockSpec((TILE_N, hid_pad), lambda k: (k, 0)),
            pl.BlockSpec((b_pad, 1), lambda k: (0, 0)),
            pl.BlockSpec((hid_pad, mid_pad), lambda k: (0, 0)),
            pl.BlockSpec((1, mid_pad), lambda k: (0, 0)),
            pl.BlockSpec((mid_pad, c_pad), lambda k: (0, 0)),
            pl.BlockSpec((1, c_pad), lambda k: (0, 0)),
        ],
        out_specs=pl.BlockSpec((b_pad, c_pad), lambda k: (0, 0)),
        out_shape=jax.ShapeDtypeStruct((b_pad, c_pad), jnp.float32),
        scratch_shapes=[pltpu.VMEM((b_pad, hid_pad), jnp.float32)],
        compiler_params=pltpu.CompilerParams(
            dimension_semantics=("arbitrary",),
            vmem_limit_bytes=VMEM_LIMIT),
    )(onehot, h, inv_counts, wc1, bc1, wc2, bc2)

    return out[:num_graphs, :num_classes]


# --------------------------- parameter setup ----------------------------------
def init_params(key, in_channels, hid, num_classes, num_unit):
    def u(key, shape, scale=0.1):
        return jax.random.uniform(key, shape, jnp.float32, -scale, scale)

    ks = jax.random.split(key, 16)
    return {
        "w_emb": u(ks[0], (in_channels, hid)),
        "b_emb": u(ks[1], (1, hid)),
        # LEConv weights stacked along layer axis
        "w1": u(ks[2], (num_unit, hid, hid)),
        "b1": u(ks[3], (num_unit, 1, hid)),
        "w2": u(ks[4], (num_unit, hid, hid)),          # lin2 has no bias in LEConv
        "w3": u(ks[5], (num_unit, hid, hid)),
        "b3": u(ks[6], (num_unit, 1, hid)),
        # causal_mlp
        "wc1": u(ks[7], (hid, 2 * hid)),
        "bc1": u(ks[8], (1, 2 * hid)),
        "wc2": u(ks[9], (2 * hid, num_classes)),
        "bc2": u(ks[10], (1, num_classes)),
    }


# --------------------------- pure-JAX reference -------------------------------
def reference_forward(x, edge_index, edge_attr, batch, params, num_graphs):
    src, dst = edge_index[0], edge_index[1]
    n = x.shape[0]
    h = x @ params["w_emb"] + params["b_emb"]
    for l in range(params["w1"].shape[0]):
        a = h @ params["w1"][l] + params["b1"][l]
        b = h @ params["w2"][l]
        c = h @ params["w3"][l] + params["b3"][l]
        msg = edge_attr[:, None] * (a[src] - b[dst])
        agg = jnp.zeros((n, h.shape[1]), jnp.float32).at[dst].add(msg)
        h = jax.nn.relu(agg + c)
    onehot = (batch[None, :] == jnp.arange(num_graphs)[:, None]).astype(jnp.float32)
    g = (onehot @ h) / jnp.maximum(onehot.sum(1, keepdims=True), 1.0)
    hm = jax.nn.relu(g @ params["wc1"] + params["bc1"])
    return hm @ params["wc2"] + params["bc2"]


# --------------------------------- main ---------------------------------------
if __name__ == "__main__":
    in_channels, hid, num_classes, num_unit = 4, 64, 3, 2
    num_nodes, num_edges, num_graphs = 16, 32, 2

    key = jax.random.PRNGKey(0)
    k_par, k_x, k_src, k_dst, k_w = jax.random.split(key, 5)

    params = init_params(k_par, in_channels, hid, num_classes, num_unit)

    x = jax.random.normal(k_x, (num_nodes, in_channels), jnp.float32)
    src = jax.random.randint(k_src, (num_edges,), 0, num_nodes, jnp.int32)
    dst = jax.random.randint(k_dst, (num_edges,), 0, num_nodes, jnp.int32)
    edge_index = jnp.stack([src, dst], axis=0)
    edge_attr = jax.random.uniform(k_w, (num_edges,), jnp.float32)
    batch = jnp.concatenate([jnp.zeros(num_nodes // 2, jnp.int32),
                             jnp.ones(num_nodes - num_nodes // 2, jnp.int32)])

    out = spmotif_forward(x, edge_index, edge_attr, batch, params, num_graphs)
    out = jax.block_until_ready(out)

    ref = reference_forward(x, edge_index, edge_attr, batch, params, num_graphs)
    assert out.shape == (num_graphs, num_classes)
    # bf16 operands (x, h, Wcat, A, alin, onehot) introduce ~0.5-1% relative error vs. f32
    err = float(jnp.max(jnp.abs(out - ref)))
    scale = float(jnp.max(jnp.abs(ref))) + 1e-6
    assert err <= 4e-2 * scale + 2e-3, (err, scale, out, ref)

    print("KERNEL_OK")
</pallas_src>

<mosaic_0001>
module attributes {stable_mosaic.version = 11 : i64} {
  func.func @transform_kernel(%arg0: i32, %arg1: memref<512x128xbf16, #tpu.memory_space<vmem>>, %arg2: memref<512x1xf32, #tpu.memory_space<vmem>>, %arg3: memref<128x384xbf16, #tpu.memory_space<vmem>>, %arg4: memref<1x384xf32, #tpu.memory_space<vmem>>, %arg5: memref<512x128xbf16, #tpu.memory_space<vmem>>, %arg6: memref<512x128xf32, #tpu.memory_space<vmem>>) attributes {dimension_semantics = [#tpu.dimension_semantics<parallel>], iteration_bounds = array<i64: 1>, scalar_prefetch = 0 : i64, scratch_operands = 0 : i64, tpu.core_type = #tpu.core_type<tc>, window_params = [{transform_indices = @transform_0, window_bounds = array<i64: 512, 128>}, {transform_indices = @transform_1, window_bounds = array<i64: 512, 1>}, {pipeline_mode = #tpu.pipeline_mode<synchronous>, transform_indices = @transform_2, window_bounds = array<i64: 128, 384>}, {pipeline_mode = #tpu.pipeline_mode<synchronous>, transform_indices = @transform_3, window_bounds = array<i64: 1, 384>}, {transform_indices = @transform_4, window_bounds = array<i64: 512, 128>}, {transform_indices = @transform_5, window_bounds = array<i64: 512, 128>}]} {
    %c0 = arith.constant 0 : index
    %c0_0 = arith.constant 0 : index
    %0 = vector.load %arg1[%c0, %c0_0] : memref<512x128xbf16, #tpu.memory_space<vmem>>, vector<512x128xbf16>
    %c0_1 = arith.constant 0 : index
    %c0_2 = arith.constant 0 : index
    %1 = vector.load %arg3[%c0_1, %c0_2] : memref<128x384xbf16, #tpu.memory_space<vmem>>, vector<128x384xbf16>
    %cst = arith.constant dense<0.000000e+00> : vector<512x384xf32>
    %2 = tpu.matmul %0, %1, %cst {dimension_numbers = #tpu.dot_dimension_numbers<[1], [0], [0], [1], [0, 0, 1, 1], [], []>} : vector<512x128xbf16>, vector<128x384xbf16>, vector<512x384xf32> -> vector<512x384xf32>
    %c0_3 = arith.constant 0 : index
    %c0_4 = arith.constant 0 : index
    %3 = vector.load %arg4[%c0_3, %c0_4] : memref<1x384xf32, #tpu.memory_space<vmem>>, vector<1x384xf32>
    %4 = vector.broadcast %3 : vector<1x384xf32> to vector<512x384xf32>
    %5 = arith.addf %2, %4 : vector<512x384xf32>
    %6 = vector.extract_strided_slice %5 {offsets = [0, 0], sizes = [512, 128], strides = [1, 1]} : vector<512x384xf32> to vector<512x128xf32>
    %7 = arith.truncf %6 : vector<512x128xf32> to vector<512x128xbf16>
    %c0_5 = arith.constant 0 : index
    %c0_6 = arith.constant 0 : index
    %8 = vector.load %arg5[%c0_5, %c0_6] : memref<512x128xbf16, #tpu.memory_space<vmem>>, vector<512x128xbf16>
    tpu.vector_store %arg5[%c0_5, %c0_6], %7 {strides = array<i32>} : memref<512x128xbf16, #tpu.memory_space<vmem>>, vector<512x128xbf16>,
    %9 = vector.extract_strided_slice %5 {offsets = [0, 256], sizes = [512, 128], strides = [1, 1]} : vector<512x384xf32> to vector<512x128xf32>
    %c0_7 = arith.constant 0 : index
    %c0_8 = arith.constant 0 : index
    %10 = vector.load %arg2[%c0_7, %c0_8] : memref<512x1xf32, #tpu.memory_space<vmem>>, vector<512x1xf32>
    %11 = vector.extract_strided_slice %5 {offsets = [0, 128], sizes = [512, 128], strides = [1, 1]} : vector<512x384xf32> to vector<512x128xf32>
    %12 = vector.broadcast %10 : vector<512x1xf32> to vector<512x128xf32>
    %13 = arith.mulf %12, %11 : vector<512x128xf32>
    %14 = arith.subf %9, %13 : vector<512x128xf32>
    %c0_9 = arith.constant 0 : index
    %c0_10 = arith.constant 0 : index
    %15 = vector.load %arg6[%c0_9, %c0_10] : memref<512x128xf32, #tpu.memory_space<vmem>>, vector<512x128xf32>
    tpu.vector_store %arg6[%c0_9, %c0_10], %14 {strides = array<i32>} : memref<512x128xf32, #tpu.memory_space<vmem>>, vector<512x128xf32>,
    return
  }
  func.func @transform_0(%arg0: i32) -> (i32, i32) {
    %c0_i32 = arith.constant 0 : i32
    %c0_i32_0 = arith.constant 0 : i32
    return %arg0, %c0_i32 : i32, i32
  }
  func.func @transform_1(%arg0: i32) -> (i32, i32) {
    %c0_i32 = arith.constant 0 : i32
    %c0_i32_0 = arith.constant 0 : i32
    return %arg0, %c0_i32 : i32, i32
  }
  func.func @transform_2(%arg0: i32) -> (i32, i32) {
    %c0_i32 = arith.constant 0 : i32
    %c0_i32_0 = arith.constant 0 : i32
    %c0_i32_1 = arith.constant 0 : i32
    return %c0_i32, %c0_i32_0 : i32, i32
  }
  func.func @transform_3(%arg0: i32) -> (i32, i32) {
    %c0_i32 = arith.constant 0 : i32
    %c0_i32_0 = arith.constant 0 : i32
    %c0_i32_1 = arith.constant 0 : i32
    return %c0_i32, %c0_i32_0 : i32, i32
  }
  func.func @transform_4(%arg0: i32) -> (i32, i32) {
    %c0_i32 = arith.constant 0 : i32
    %c0_i32_0 = arith.constant 0 : i32
    return %arg0, %c0_i32 : i32, i32
  }
  func.func @transform_5(%arg0: i32) -> (i32, i32) {
    %c0_i32 = arith.constant 0 : i32
    %c0_i32_0 = arith.constant 0 : i32
    return %arg0, %c0_i32 : i32, i32
  }
}

</mosaic_0001>

<bundles_post_ra>
// kernel: tpu_custom_call.1
= control target key start
LH: loop header
LB: loop body
LE: loop exit
PB: predicated region body
PF: predicated region fallthrough
CT: control target
= control target key end

     0   :  { %11 = vsyncpa [#allocation3], 0  ;;  %v2657_v2 = vmov 0   ;;  %s3702_s0 = inlined_call_operand.vmem [shape: bf16[512,128], index: 0, kind: input, shape index: {}]   ;;  %s3703_s1 = inlined_call_operand.vmem [shape: f32[512,1], index: 1, kind: input, shape index: {}]   ;;  %s3704_s2 = inlined_call_operand.vmem [shape: bf16[128,384], index: 2, kind: input, shape index: {}]   ;;  %s3705_s3 = inlined_call_operand.vmem [shape: f32[1,384], index: 3, kind: input, shape index: {}]   ;;  %s3706_s4 = inlined_call_operand.hbm [shape: bf16[512,128], index: 4, kind: output, shape index: {0}]   ;;  %s3707_s5 = inlined_call_operand.hbm [shape: f32[512,128], index: 5, kind: output, shape index: {1}]  }
   0x1   :  { %v2545_v0 = vld [vmem:[%s3704_s2 + $0x4] ss:$12 sps:$4 sm:$0xff]   ;;  %v2547_v1 = vld [vmem:[%s3704_s2] ss:$12 sps:$4 sm:$0xff]   ;;  %2543 = vset.pattern.permute.xlu0 %v2657_v2  ;;  %2544 = vset.pattern.permute.xlu1 %v2657_v2  ;;  %v2548_v3 = vld [vmem:[%s3704_s2 + $0x1c] ss:$12 sps:$4 sm:$0xff]  }
   0x2   :  { %455 = vmatprep.subr.bf16.mxu0 %v2545_v0  ;;  %2520 = vmatprep.subr.bf16.mxu1 %v2545_v0  ;;  %v2550_v4 = vld [vmem:[%s3704_s2 + $0x18] ss:$12 sps:$4 sm:$0xff]   ;;  %v2551_v5 = vld [vmem:[%s3704_s2 + $0x34] ss:$12 sps:$4 sm:$0xff]   ;;  %v2553_v6 = vld [vmem:[%s3704_s2 + $0x30] ss:$12 sps:$4 sm:$0xff]  }
   0x3   :  { %456 = vmatpush1.bf16.msra.mxu0 %v2547_v1  ;;  %2528 = vmatpush1.bf16.msra.mxu1 %v2547_v1  ;;  %v2554_v7 = vld [vmem:[%s3704_s2 + $0x4c] ss:$12 sps:$4 sm:$0xff]   ;;  %v1417_v8 = vld [vmem:[%s3703_s1] sm:$0xff]  ;;  %v1419_v9 = vld [vmem:[%s3703_s1 + $0x10] sm:$0xff] }
   0x4   :  { %457 = vmatprep.subr.bf16.mxu0 %v2548_v3  ;;  %2521 = vmatprep.subr.bf16.mxu1 %v2548_v3  ;;  %v1418_v10 = vld [vmem:[%s3703_s1 + $0x8] sm:$0xff]  ;;  %v1420_v12 = vld [vmem:[%s3703_s1 + $0x18] sm:$0xff]  ;;  %v2557_v13 = vld [vmem:[%s3704_s2 + $0x64] ss:$12 sps:$4 sm:$0xff]  }
   0x5   :  { %487 = vmatprep.mubr.bf16.mxu0 %v2657_v2  ;;  %727 = vmatprep.mubr.bf16.mxu1 %v2657_v2  ;;  %v2556_v11 = vld [vmem:[%s3704_s2 + $0x48] ss:$12 sps:$4 sm:$0xff]   ;;  %v1421_v14 = vld [vmem:[%s3703_s1 + $0x20] sm:$0xff]  ;;  %v1424_v20 = vld [vmem:[%s3703_s1 + $0x38] sm:$0xff] }
   0x6   :  { %1483 = vperm.xlu0 %2543, %v1417_v8   ;;  %1493 = vperm.xlu1 %2544, %v1419_v9   ;;  %v2559_v15 = vld [vmem:[%s3704_s2 + $0x60] ss:$12 sps:$4 sm:$0xff]   ;;  %v2560_v17 = vld [vmem:[%s3704_s2 + $0x7c] ss:$12 sps:$4 sm:$0xff]   ;;  %v2562_v18 = vld [vmem:[%s3704_s2 + $0x78] ss:$12 sps:$4 sm:$0xff]  }
   0x7   :  { %458 = vmatpush1.bf16.msra.mxu0 %v2550_v4  ;;  %2529 = vmatpush1.bf16.msra.mxu1 %v2550_v4  ;;  %v1422_v16 = vld [vmem:[%s3703_s1 + $0x28] sm:$0xff]  ;;  %v1423_v19 = vld [vmem:[%s3703_s1 + $0x30] sm:$0xff]  ;;  %v1425_v23 = vld [vmem:[%s3703_s1 + $0x40] sm:$0xff] }
   0x8   :  { %459 = vmatprep.subr.bf16.mxu0 %v2551_v5  ;;  %2522 = vmatprep.subr.bf16.mxu1 %v2551_v5  ;;  %v2563_v21 = vld [vmem:[%s3704_s2 + $0x94] ss:$12 sps:$4 sm:$0xff]   ;;  %v2565_v22 = vld [vmem:[%s3704_s2 + $0x90] ss:$12 sps:$4 sm:$0xff]   ;;  %v1426_v24 = vld [vmem:[%s3703_s1 + $0x48] sm:$0xff] }
   0x9   :  { %v2566_v25 = vld [vmem:[%s3704_s2 + $0xac] ss:$12 sps:$4 sm:$0xff]   ;;  %v1427_v26 = vld [vmem:[%s3703_s1 + $0x50] sm:$0xff]  ;;  %v2788_v30 = vld [vmem:[%s3702_s0] sm:$0xff]  }
   0xa   :  { %1488 = vperm.xlu0 %2543, %v1418_v10   ;;  %1498 = vperm.xlu1 %2544, %v1420_v12   ;;  %v2568_v27 = vld [vmem:[%s3704_s2 + $0xa8] ss:$12 sps:$4 sm:$0xff]   ;;  %v1428_v28 = vld [vmem:[%s3703_s1 + $0x58] sm:$0xff]  ;;  %v2793_v31 = vld [vmem:[%s3702_s0 + $0xc0] sm:$0xff]  }
   0xb   :  { %460 = vmatpush1.bf16.msra.mxu0 %v2553_v6  ;;  %2530 = vmatpush1.bf16.msra.mxu1 %v2553_v6  ;;  %v2571_v29 = vld [vmem:[%s3704_s2 + $0x8] ss:$12 sps:$4 sm:$0xff]   ;;  %v1429_v32 = vld [vmem:[%s3703_s1 + $0x60] sm:$0xff]  ;;  %v1432_v39 = vld [vmem:[%s3703_s1 + $0x78] sm:$0xff] }
   0xc   :  { %461 = vmatprep.subr.bf16.mxu0 %v2554_v7  ;;  %2523 = vmatprep.subr.bf16.mxu1 %v2554_v7  ;;  %v2574_v33 = vld [vmem:[%s3704_s2 + $0x20] ss:$12 sps:$4 sm:$0xff]   ;;  %v1431_v35 = vld [vmem:[%s3703_s1 + $0x70] sm:$0xff]  ;;  %v2577_v36 = vld [vmem:[%s3704_s2 + $0x38] ss:$12 sps:$4 sm:$0xff]  }
   0xd   :  { %v1430_v34 = vld [vmem:[%s3703_s1 + $0x68] sm:$0xff]  ;;  %v1433_v40 = vld [vmem:[%s3703_s1 + $0x80] sm:$0xff]  ;;  %v2580_v41 = vld [vmem:[%s3704_s2 + $0x50] ss:$12 sps:$4 sm:$0xff]  }
   0xe   :  { %1503 = vperm.xlu0 %2543, %v1421_v14   ;;  %1508 = vperm.xlu1 %2544, %v1422_v16   ;;  %v2817_v37 = vld [vmem:[%s3702_s0 + $0x8] sm:$0xff]   ;;  %v1435_v43 = vld [vmem:[%s3703_s1 + $0x90] sm:$0xff]  ;;  %v1436_v47 = vld [vmem:[%s3703_s1 + $0x98] sm:$0xff] }
   0xf   :  { %462 = vmatpush1.bf16.msra.mxu0 %v2556_v11  ;;  %2531 = vmatpush1.bf16.msra.mxu1 %v2556_v11  ;;  %v2822_v38 = vld [vmem:[%s3702_s0 + $0xc8] sm:$0xff]   ;;  %v2849_v45 = vld [vmem:[%s3702_s0 + $0x10] sm:$0xff]   ;;  %v1437_v48 = vld [vmem:[%s3703_s1 + $0xa0] sm:$0xff] }
  0x10   :  { %463 = vmatprep.subr.bf16.mxu0 %v2557_v13  ;;  %2524 = vmatprep.subr.bf16.mxu1 %v2557_v13  ;;  %v1434_v42 = vld [vmem:[%s3703_s1 + $0x88] sm:$0xff]  ;;  %v2854_v46 = vld [vmem:[%s3702_s0 + $0xd0] sm:$0xff]   ;;  %v2875_v51 = vld [vmem:[%s3702_s0 + $0x18] sm:$0xff]  }
  0x11   :  { %v2583_v44 = vld [vmem:[%s3704_s2 + $0x68] ss:$12 sps:$4 sm:$0xff]   ;;  %v2586_v49 = vld [vmem:[%s3704_s2 + $0x80] ss:$12 sps:$4 sm:$0xff]   ;;  %v2880_v52 = vld [vmem:[%s3702_s0 + $0xd8] sm:$0xff]  }
  0x12   :  { %1513 = vperm.xlu0 %2543, %v1423_v19   ;;  %1518 = vperm.xlu1 %2544, %v1424_v20   ;;  %v1438_v50 = vld [vmem:[%s3703_s1 + $0xa8] sm:$0xff]  ;;  %v1439_v53 = vld [vmem:[%s3703_s1 + $0xb0] sm:$0xff]  ;;  %v2589_v54 = vld [vmem:[%s3704_s2 + $0x98] ss:$12 sps:$4 sm:$0xff]  }
  0x13   :  { %464 = vmatpush1.bf16.msra.mxu0 %v2559_v15  ;;  %2532 = vmatpush1.bf16.msra.mxu1 %v2559_v15  ;;  %v1440_v55 = vld [vmem:[%s3703_s1 + $0xb8] sm:$0xff]  ;;  %v1441_v56 = vld [vmem:[%s3703_s1 + $0xc0] sm:$0xff]  ;;  %v1442_v58 = vld [vmem:[%s3703_s1 + $0xc8] sm:$0xff] }
  0x14   :  { %465 = vmatprep.subr.bf16.mxu0 %v2560_v17  ;;  %2525 = vmatprep.subr.bf16.mxu1 %v2560_v17  ;;  %v2592_v57 = vld [vmem:[%s3704_s2 + $0xb0] ss:$12 sps:$4 sm:$0xff]   ;;  %v2907_v59 = vld [vmem:[%s3702_s0 + $0x20] sm:$0xff]   ;;  %v1446_v0 = vld [vmem:[%s3703_s1 + $0xe8] sm:$0xff] }
  0x15   :  { %v2912_v60 = vld [vmem:[%s3702_s0 + $0xe0] sm:$0xff]   ;;  %v1443_v61 = vld [vmem:[%s3703_s1 + $0xd0] sm:$0xff]  ;;  %v1444_v62 = vld [vmem:[%s3703_s1 + $0xd8] sm:$0xff] }
  0x16   :  { %1523 = vperm.xlu0 %2543, %v1425_v23   ;;  %1528 = vperm.xlu1 %2544, %v1426_v24   ;;  %v1445_v63 = vld [vmem:[%s3703_s1 + $0xe0] sm:$0xff]  ;;  %v2933_v1 = vld [vmem:[%s3702_s0 + $0x28] sm:$0xff]   ;;  %v1447_v4 = vld [vmem:[%s3703_s1 + $0xf0] sm:$0xff] }
  0x17   :  { %466 = vmatpush1.bf16.msra.mxu0 %v2562_v18  ;;  %2533 = vmatpush1.bf16.msra.mxu1 %v2562_v18  ;;  %v2938_v3 = vld [vmem:[%s3702_s0 + $0xe8] sm:$0xff]   ;;  %v1448_v5 = vld [vmem:[%s3703_s1 + $0xf8] sm:$0xff] }
  0x18   :  { %467 = vmatprep.subr.bf16.mxu0 %v2563_v21  ;;  %2526 = vmatprep.subr.bf16.mxu1 %v2563_v21 }
  0x1a   :  { %1533 = vperm.xlu0 %2543, %v1427_v26   ;;  %1538 = vperm.xlu1 %2544, %v1428_v28  }
  0x1b   :  { %468 = vmatpush1.bf16.msra.mxu0 %v2565_v22  ;;  %2534 = vmatpush1.bf16.msra.mxu1 %v2565_v22 }
  0x1c   :  { %469 = vmatprep.subr.bf16.mxu0 %v2566_v25  ;;  %2527 = vmatprep.subr.bf16.mxu1 %v2566_v25 }
  0x1e   :  { %1543 = vperm.xlu0 %2543, %v1429_v32   ;;  %1548 = vperm.xlu1 %2544, %v1430_v34  }
  0x1f   :  { %470 = vmatpush1.bf16.msra.mxu0 %v2568_v27  ;;  %2535 = vmatpush1.bf16.msra.mxu1 %v2568_v27 }
  0x20   :  { %2440 = vmatprep.subr.bf16.mxu1 %v2571_v29 }
  0x22   :  { %488 = vmatmul.mubr.bf16.vlgmr.msra.gmra.mrb[0].mxu0 %v2788_v30  ;;  %728 = vmatmul.mubr.bf16.vlgmr.msra.gmra.mrb[0].mxu1 %v2793_v31 }
  0x23   :  { %2441 = vmatpush3.bf16.msra.mxu1 %v2571_v29  ;;  %497 = vmatprep.mubr.bf16.mxu0 %v2657_v2 }
  0x24   :  { %737 = vmatprep.mubr.bf16.mxu1 %v2657_v2  ;;  %2442 = vmatprep.subr.bf16.mxu1 %v2574_v33 }
  0x25   :  { %1553 = vperm.xlu0 %2543, %v1431_v35   ;;  %1558 = vperm.xlu1 %2544, %v1432_v39  }
  0x27   :  { %2443 = vmatpush3.bf16.msra.mxu1 %v2574_v33 }
  0x28   :  { %2444 = vmatprep.subr.bf16.mxu1 %v2577_v36 }
  0x29   :  { %1563 = vperm.xlu0 %2543, %v1433_v40   ;;  %1568 = vperm.xlu1 %2544, %v1434_v42  }
  0x2a   :  { %498 = vmatmul.mubr.bf16.gmra.mrb[4].mxu0 %v2817_v37  ;;  %738 = vmatmul.mubr.bf16.gmra.mrb[4].mxu1 %v2822_v38 }
  0x2b   :  { %507 = vmatprep.mubr.bf16.mxu0 %v2657_v2  ;;  %747 = vmatprep.mubr.bf16.mxu1 %v2657_v2 }
  0x2c   :  { %2445 = vmatpush3.bf16.msra.mxu1 %v2577_v36 }
  0x2d   :  { %2446 = vmatprep.subr.bf16.mxu1 %v2580_v41  ;;  %1573 = vperm.xlu0 %2543, %v1435_v43  }
  0x2e   :  { %1578 = vperm.xlu1 %2544, %v1436_v47  }
  0x30   :  { %2447 = vmatpush3.bf16.msra.mxu1 %v2580_v41 }
  0x31   :  { %2448 = vmatprep.subr.bf16.mxu1 %v2583_v44  ;;  %1583 = vperm.xlu0 %2543, %v1437_v48  }
  0x32   :  { %508 = vmatmul.mubr.bf16.gmra.mrb[8].mxu0 %v2849_v45  ;;  %748 = vmatmul.mubr.bf16.gmra.mrb[8].mxu1 %v2854_v46 }
  0x33   :  { %517 = vmatprep.mubr.bf16.mxu0 %v2657_v2  ;;  %757 = vmatprep.mubr.bf16.mxu1 %v2657_v2 }
  0x34   :  { %2449 = vmatpush3.bf16.msra.mxu1 %v2583_v44  ;;  %1588 = vperm.xlu1 %2544, %v1438_v50  }
  0x35   :  { %2450 = vmatprep.subr.bf16.mxu1 %v2586_v49  ;;  %1593 = vperm.xlu0 %2543, %v1439_v53  }
  0x38   :  { %2451 = vmatpush3.bf16.msra.mxu1 %v2586_v49  ;;  %1598 = vperm.xlu1 %2544, %v1440_v55  }
  0x39   :  { %2452 = vmatprep.subr.bf16.mxu1 %v2589_v54  ;;  %1603 = vperm.xlu0 %2543, %v1441_v56  }
  0x3a   :  { %518 = vmatmul.mubr.bf16.gmra.mrb[12].mxu0 %v2875_v51  ;;  %758 = vmatmul.mubr.bf16.gmra.mrb[12].mxu1 %v2880_v52 }
  0x3b   :  { %527 = vmatprep.mubr.bf16.mxu0 %v2657_v2  ;;  %767 = vmatprep.mubr.bf16.mxu1 %v2657_v2 }
  0x3c   :  { %2453 = vmatpush3.bf16.msra.mxu1 %v2589_v54  ;;  %1608 = vperm.xlu1 %2544, %v1442_v58  }
  0x3d   :  { %2454 = vmatprep.subr.bf16.mxu1 %v2592_v57  ;;  %1613 = vperm.xlu0 %2543, %v1443_v61  }
  0x40   :  { %2455 = vmatpush3.bf16.msra.mxu1 %v2592_v57  ;;  %1618 = vperm.xlu1 %2544, %v1444_v62  }
  0x41   :  { %1623 = vperm.xlu0 %2543, %v1445_v63  }
  0x42   :  { %528 = vmatmul.mubr.bf16.gmra.mrb[16].mxu0 %v2907_v59  ;;  %768 = vmatmul.mubr.bf16.gmra.mrb[16].mxu1 %v2912_v60 }
  0x43   :  { %537 = vmatprep.mubr.bf16.mxu0 %v2657_v2  ;;  %777 = vmatprep.mubr.bf16.mxu1 %v2657_v2 }
  0x44   :  { %1628 = vperm.xlu1 %2544, %v1446_v0  }
  0x45   :  { %1633 = vperm.xlu0 %2543, %v1447_v4  }
  0x46   :  { %12 = vsyncpa [#allocation5], 0  ;;  %v1449_v6 = vld [vmem:[%s3703_s1 + $0x100] sm:$0xff]  ;;  %v1450_v7 = vld [vmem:[%s3703_s1 + $0x108] sm:$0xff]  ;;  %s2659_s29 = smov [#allocation4]  }
  0x47   :  { %v1451_v8 = vld [vmem:[%s3703_s1 + $0x110] sm:$0xff]  ;;  %v1452_v11 = vld [vmem:[%s3703_s1 + $0x118] sm:$0xff]  ;;  %v1453_v12 = vld [vmem:[%s3703_s1 + $0x120] sm:$0xff]  ;;  %s2010_s30 = sshll.u32 %s2659_s29, 4  ;;  %s3666_s30 = int_to_ptr.vmem [resolvable:$true] %s2010_s30 }
  0x48   :  { %1638 = vperm.xlu1 %2544, %v1448_v5   ;;  %v2587_v9 = vld [vmem:[%s3702_s0 + $0x30] sm:$0xff]   ;;  %v1454_v13 = vld [vmem:[%s3703_s1 + $0x128] sm:$0xff]  ;;  %v2590_v15 = vld [vmem:[%s3702_s0 + $0x38] sm:$0xff]  }
  0x49   :  { %1643 = vperm.xlu0 %2543, %v1449_v6   ;;  %v2965_v10 = vld [vmem:[%s3702_s0 + $0xf0] sm:$0xff]   ;;  %v2988_v16 = vld [vmem:[%s3702_s0 + $0xf8] sm:$0xff]   ;;  %v1457_v18 = vld [vmem:[%s3703_s1 + $0x140] sm:$0xff] }
  0x4a   :  { %538 = vmatmul.mubr.bf16.gmra.mrb[20].mxu0 %v2933_v1  ;;  %778 = vmatmul.mubr.bf16.gmra.mrb[20].mxu1 %v2938_v3  ;;  %v1455_v14 = vld [vmem:[%s3703_s1 + $0x130] sm:$0xff]  ;;  %v1456_v17 = vld [vmem:[%s3703_s1 + $0x138] sm:$0xff]  ;;  %v1458_v19 = vld [vmem:[%s3703_s1 + $0x148] sm:$0xff] }
  0x4b   :  { %547 = vmatprep.mubr.bf16.mxu0 %v2657_v2  ;;  %787 = vmatprep.mubr.bf16.mxu1 %v2657_v2  ;;  %v1459_v20 = vld [vmem:[%s3703_s1 + $0x150] sm:$0xff]  ;;  %v2593_v21 = vld [vmem:[%s3702_s0 + $0x40] sm:$0xff]   ;;  %v1460_v22 = vld [vmem:[%s3703_s1 + $0x158] sm:$0xff] }
  0x4c   :  { %1648 = vperm.xlu1 %2544, %v1450_v7   ;;  %v1461_v23 = vld [vmem:[%s3703_s1 + $0x160] sm:$0xff]  ;;  %v1462_v24 = vld [vmem:[%s3703_s1 + $0x168] sm:$0xff]  ;;  %v1463_v25 = vld [vmem:[%s3703_s1 + $0x170] sm:$0xff] }
  0x4d   :  { %1653 = vperm.xlu0 %2543, %v1451_v8   ;;  %v2594_v26 = vld [vmem:[%s3702_s0 + $0x48] sm:$0xff]   ;;  %v1464_v27 = vld [vmem:[%s3703_s1 + $0x178] sm:$0xff]  ;;  %v1465_v28 = vld [vmem:[%s3703_s1 + $0x180] sm:$0xff]  ;;  %v120_v8 = vlaneseq }
  0x4e   :  { %v1466_v29 = vld [vmem:[%s3703_s1 + $0x188] sm:$0xff]  ;;  %v2595_v32 = vld [vmem:[%s3702_s0 + $0x50] sm:$0xff]   ;;  %v1468_v33 = vld [vmem:[%s3703_s1 + $0x198] sm:$0xff] }
  0x4f   :  { %v1469_v34 = vld [vmem:[%s3703_s1 + $0x1a0] sm:$0xff]  ;;  %v1470_v35 = vld [vmem:[%s3703_s1 + $0x1a8] sm:$0xff]  ;;  %v1471_v36 = vld [vmem:[%s3703_s1 + $0x1b0] sm:$0xff] }
  0x50   :  { %1658 = vperm.xlu1 %2544, %v1452_v11   ;;  %v1472_v39 = vld [vmem:[%s3703_s1 + $0x1b8] sm:$0xff]  ;;  %v1473_v40 = vld [vmem:[%s3703_s1 + $0x1c0] sm:$0xff]  ;;  %v1474_v41 = vld [vmem:[%s3703_s1 + $0x1c8] sm:$0xff] }
  0x51   :  { %1663 = vperm.xlu0 %2543, %v1453_v12   ;;  %v1475_v42 = vld [vmem:[%s3703_s1 + $0x1d0] sm:$0xff]  ;;  %v2597_v43 = vld [vmem:[%s3702_s0 + $0x60] sm:$0xff]   ;;  %v1476_v44 = vld [vmem:[%s3703_s1 + $0x1d8] sm:$0xff] }
  0x52   :  { %548 = vmatmul.mubr.bf16.gmra.mrb[24].mxu0 %v2587_v9  ;;  %788 = vmatmul.mubr.bf16.gmra.mrb[24].mxu1 %v2965_v10  ;;  %v1478_v47 = vld [vmem:[%s3703_s1 + $0x1e8] sm:$0xff]  ;;  %v1479_v48 = vld [vmem:[%s3703_s1 + $0x1f0] sm:$0xff]  ;;  %v1480_v50 = vld [vmem:[%s3703_s1 + $0x1f8] sm:$0xff] }
  0x53   :  { %557 = vmatprep.mubr.bf16.mxu0 %v2657_v2  ;;  %797 = vmatprep.mubr.bf16.mxu1 %v2657_v2  ;;  %v2598_v49 = vld [vmem:[%s3702_s0 + $0x68] sm:$0xff]   ;;  %v2600_v53 = vld [vmem:[%s3702_s0 + $0x78] sm:$0xff]   ;;  %v2601_v54 = vld [vmem:[%s3702_s0 + $0x80] sm:$0xff]  }
  0x54   :  { %1668 = vperm.xlu1 %2544, %v1454_v13   ;;  %v2602_v55 = vld [vmem:[%s3702_s0 + $0x88] sm:$0xff]   ;;  %v2603_v56 = vld [vmem:[%s3702_s0 + $0x90] sm:$0xff]   ;;  %v2604_v57 = vld [vmem:[%s3702_s0 + $0x98] sm:$0xff]  }
  0x55   :  { %1673 = vperm.xlu0 %2543, %v1455_v14   ;;  %v2605_v58 = vld [vmem:[%s3702_s0 + $0xa0] sm:$0xff]   ;;  %v2607_v61 = vld [vmem:[%s3702_s0 + $0xb0] sm:$0xff]   ;;  %v2608_v62 = vld [vmem:[%s3702_s0 + $0xb8] sm:$0xff]  }
  0x56   :  { %v3182_v13 = vld [vmem:[%s3705_s3] sm:$0x7]  ;;  %s2658_s3 = smov [#allocation2]  }
  0x57   :  { %s1998_s28 = sshll.u32 %s2658_s3, 4  ;;  %s3661_s28 = int_to_ptr.vmem [resolvable:$true] %s1998_s28 }
  0x58   :  { %1678 = vperm.xlu1 %2544, %v1456_v17   ;;  %s2609_s6 = scalar_lea.vmem %s3661_s28, 4096  ;;  %p2614_p1 = scmp.lt.s32.totalorder %s3661_s28, %s3661_s28 }
  0x59   :  { %1683 = vperm.xlu0 %2543, %v1457_v18   ;;  %p2610_p0 = scmp.ne.s32.totalorder %s3661_s28, %s2609_s6  ;;  %p2615_p2 = scmp.lt.s32.totalorder %s2609_s6, %s2609_s6 }
  0x5a   :  { %558 = vmatmul.mubr.bf16.gmra.mrb[28].mxu0 %v2590_v15  ;;  %798 = vmatmul.mubr.bf16.gmra.mrb[28].mxu1 %v2988_v16 }
  0x5b   :  { %567 = vmatprep.mubr.bf16.mxu0 %v2657_v2  ;;  %2456 = vmatprep.mubr.bf16.mxu1 %v2788_v30  ;;  %v1467_v30 = vld [vmem:[%s3703_s1 + $0x190] sm:$0xff]  ;;  %p2616_p3 = por %p2615_p2, %p2614_p1 }
  0x5c   :  { %1688 = vperm.xlu1 %2544, %v1458_v19  }
  0x5d   :  { %1693 = vperm.xlu0 %2543, %v1459_v20   ;;  %p2617_p4 = pnand %p2616_p3, %p2610_p0 }
  0x60   :  { %1698 = vperm.xlu1 %2544, %v1460_v22  }
  0x61   :  { %1703 = vperm.xlu0 %2543, %v1461_v23  }
  0x62   :  { %568 = vmatmul.mubr.bf16.gmra.mrb[32].mxu0 %v2593_v21  ;;  %2457 = vmatmul.mubr.bf16.vlgmr.msra.gmra.mrb[32].mxu1 %v2817_v37  ;;  %v2596_v37 = vld [vmem:[%s3702_s0 + $0x58] sm:$0xff]  }
  0x63   :  { %577 = vmatprep.mubr.bf16.mxu0 %v2657_v2  ;;  %2460 = vmatprep.mubr.bf16.mxu1 %v2849_v45  ;;  %v1477_v45 = vld [vmem:[%s3703_s1 + $0x1e0] sm:$0xff] }
  0x64   :  { %1708 = vperm.xlu1 %2544, %v1462_v24  }
  0x65   :  { %1713 = vperm.xlu0 %2543, %v1463_v25  }
  0x68   :  { %1718 = vperm.xlu1 %2544, %v1464_v27  }
  0x69   :  { %1723 = vperm.xlu0 %2543, %v1465_v28  }
  0x6a   :  { %578 = vmatmul.mubr.bf16.gmra.mrb[36].mxu0 %v2594_v26  ;;  %2461 = vmatmul.mubr.bf16.gmra.mrb[36].mxu1 %v2875_v51  ;;  %v2599_v51 = vld [vmem:[%s3702_s0 + $0x70] sm:$0xff]  }
  0x6b   :  { %587 = vmatprep.mubr.bf16.mxu0 %v2657_v2  ;;  %2464 = vmatprep.mubr.bf16.mxu1 %v2907_v59  ;;  %v2606_v59 = vld [vmem:[%s3702_s0 + $0xa8] sm:$0xff]  }
  0x6c   :  { %1728 = vperm.xlu1 %2544, %v1466_v29  }
  0x6d   :  { %1733 = vperm.xlu0 %2543, %v1467_v30  }
  0x70   :  { %1738 = vperm.xlu1 %2544, %v1468_v33  }
  0x71   :  { %1743 = vperm.xlu0 %2543, %v1469_v34  }
  0x72   :  { %588 = vmatmul.mubr.bf16.gmra.mrb[40].mxu0 %v2595_v32  ;;  %2465 = vmatmul.mubr.bf16.gmra.mrb[40].mxu1 %v2933_v1 }
  0x73   :  { %597 = vmatprep.mubr.bf16.mxu0 %v2657_v2  ;;  %2468 = vmatprep.mubr.bf16.mxu1 %v2587_v9  ;;  %v3172_v9 = vshrl.u32 %v120_v8, 7 }
  0x74   :  { %1748 = vperm.xlu1 %2544, %v1470_v35  }
  0x75   :  { %1753 = vperm.xlu0 %2543, %v1471_v36   ;;  %v122_v12 = vsub.s32 0, %v3172_v9 }
  0x78   :  { %1758 = vperm.xlu1 %2544, %v1472_v39  }
  0x79   :  { %1763 = vperm.xlu0 %2543, %v1473_v40  }
  0x7a   :  { %598 = vmatmul.mubr.bf16.gmra.mrb[44].mxu0 %v2596_v37  ;;  %2469 = vmatmul.mubr.bf16.gmra.mrb[44].mxu1 %v2590_v15 }
  0x7b   :  { %607 = vmatprep.mubr.bf16.mxu0 %v2657_v2  ;;  %2472 = vmatprep.mubr.bf16.mxu1 %v2593_v21 }
  0x7c   :  { %1768 = vperm.xlu1 %2544, %v1474_v41  }
  0x7d   :  { %1773 = vperm.xlu0 %2543, %v1475_v42  }
  0x80   :  { %1778 = vperm.xlu1 %2544, %v1476_v44  }
  0x81   :  { %1783 = vperm.xlu0 %2543, %v1477_v45  }
  0x82   :  { %608 = vmatmul.mubr.bf16.gmra.mrb[48].mxu0 %v2597_v43  ;;  %2473 = vmatmul.mubr.bf16.gmra.mrb[48].mxu1 %v2594_v26 }
  0x83   :  { %617 = vmatprep.mubr.bf16.mxu0 %v2657_v2  ;;  %2476 = vmatprep.mubr.bf16.mxu1 %v2595_v32 }
  0x84   :  { %1788 = vperm.xlu1 %2544, %v1478_v47  }
  0x85   :  { %1793 = vperm.xlu0 %2543, %v1479_v48   ;;  %v3137_v63 = vpop.permute.xlu0 %1483  ;;  %v3139_v0 = vpop.permute.xlu1 %1493 }
  0x88   :  { %1798 = vperm.xlu1 %2544, %v1480_v50  }
  0x89   :  { %v3141_v1 = vpop.permute.xlu0 %1488  ;;  %v3143_v4 = vpop.permute.xlu1 %1498 }
  0x8a   :  { %618 = vmatmul.mubr.bf16.gmra.mrb[52].mxu0 %v2598_v49  ;;  %2477 = vmatmul.mubr.bf16.gmra.mrb[52].mxu1 %v2596_v37 }
  0x8b   :  { %627 = vmatprep.mubr.bf16.mxu0 %v2657_v2  ;;  %2480 = vmatprep.mubr.bf16.mxu1 %v2597_v43 }
  0x92   :  { %628 = vmatmul.mubr.bf16.gmra.mrb[56].mxu0 %v2599_v51  ;;  %2481 = vmatmul.mubr.bf16.gmra.mrb[56].mxu1 %v2598_v49 }
  0x93   :  { %637 = vmatprep.mubr.bf16.mxu0 %v2657_v2  ;;  %2484 = vmatprep.mubr.bf16.mxu1 %v2599_v51 }
  0x9a   :  { %638 = vmatmul.mubr.bf16.gmra.mrb[60].mxu0 %v2600_v53  ;;  %2485 = vmatmul.mubr.bf16.gmra.mrb[60].mxu1 %v2600_v53 }
  0x9b   :  { %647 = vmatprep.mubr.bf16.mxu0 %v2657_v2  ;;  %2488 = vmatprep.mubr.bf16.mxu1 %v2601_v54 }
  0xa2   :  { %648 = vmatmul.mubr.bf16.gmra.mrb[64].mxu0 %v2601_v54  ;;  %2489 = vmatmul.mubr.bf16.gmra.mrb[64].mxu1 %v2602_v55 }
  0xa3   :  { %657 = vmatprep.mubr.bf16.mxu0 %v2657_v2  ;;  %2492 = vmatprep.mubr.bf16.mxu1 %v2603_v56 }
  0xaa   :  { %658 = vmatmul.mubr.bf16.gmra.mrb[68].mxu0 %v2602_v55  ;;  %2493 = vmatmul.mubr.bf16.gmra.mrb[68].mxu1 %v2604_v57 }
  0xab   :  { %667 = vmatprep.mubr.bf16.mxu0 %v2657_v2  ;;  %2496 = vmatprep.mubr.bf16.mxu1 %v2605_v58 }
  0xb2   :  { %668 = vmatmul.mubr.bf16.gmra.mrb[72].mxu0 %v2603_v56  ;;  %2497 = vmatmul.mubr.bf16.gmra.mrb[72].mxu1 %v2606_v59 }
  0xb3   :  { %677 = vmatprep.mubr.bf16.mxu0 %v2657_v2  ;;  %2500 = vmatprep.mubr.bf16.mxu1 %v2607_v61 }
  0xba   :  { %678 = vmatmul.mubr.bf16.gmra.mrb[76].mxu0 %v2604_v57  ;;  %2501 = vmatmul.mubr.bf16.gmra.mrb[76].mxu1 %v2608_v62 }
  0xbb   :  { %687 = vmatprep.mubr.bf16.mxu0 %v2657_v2  ;;  %2504 = vmatprep.mubr.bf16.mxu1 %v2793_v31  ;;  %v3148_v31 = vpop.permute.xlu0 %1503 }
  0xc2   :  { %688 = vmatmul.mubr.bf16.gmra.mrb[80].mxu0 %v2605_v58  ;;  %2505 = vmatmul.mubr.bf16.gmra.mrb[80].mxu1 %v2822_v38  ;;  %v3150_v38 = vpop.permute.xlu1 %1508 }
  0xc3   :  { %697 = vmatprep.mubr.bf16.mxu0 %v2657_v2  ;;  %2508 = vmatprep.mubr.bf16.mxu1 %v2854_v46  ;;  %v3155_v46 = vpop.permute.xlu0 %1513 }
  0xc6   :  { %v3157_v5 = vpop.permute.xlu1 %1518 }
  0xca   :  { %698 = vmatmul.mubr.bf16.gmra.mrb[84].mxu0 %v2606_v59  ;;  %2509 = vmatmul.mubr.bf16.gmra.mrb[84].mxu1 %v2880_v52  ;;  %v3160_v52 = vpop.permute.xlu0 %1523 }
  0xcb   :  { %707 = vmatprep.mubr.bf16.mxu0 %v2657_v2  ;;  %2512 = vmatprep.mubr.bf16.mxu1 %v2912_v60  ;;  %v3162_v60 = vpop.permute.xlu1 %1528 }
  0xce   :  { %v3164_v6 = vpop.permute.xlu0 %1533 }
  0xcf   :  { %v3166_v7 = vpop.permute.xlu1 %1538 }
  0xd2   :  { %708 = vmatmul.mubr.bf16.gmra.mrb[88].mxu0 %v2607_v61  ;;  %2513 = vmatmul.mubr.bf16.gmra.mrb[88].mxu1 %v2938_v3  ;;  %v3168_v3 = vpop.permute.xlu0 %1543 }
  0xd3   :  { %717 = vmatprep.mubr.bf16.mxu0 %v2657_v2  ;;  %2516 = vmatprep.mubr.bf16.mxu1 %v2965_v10  ;;  %v3170_v2 = vpop.permute.xlu1 %1548 }
  0xd6   :  { %v3174_v10 = vpop.permute.xlu0 %1553 }
  0xd7   :  { %v3176_v11 = vpop.permute.xlu1 %1558 }
  0xda   :  { %718 = vmatmul.mubr.bf16.gmra.mrb[92].mxu0 %v2608_v62  ;;  %2517 = vmatmul.mubr.bf16.gmra.mrb[92].mxu1 %v2988_v16  ;;  %v3184_v14 = vpop.permute.xlu0 %1563  ;;  %v3189_v16 = vrot.slane %v3182_v13, %v122_v12 }
  0xdb   :  { %v3186_v15 = vpop.permute.xlu1 %1568 }
  0xde   :  { %v3203_v32 = vpop.permute.xlu0 %1573 }
  0xdf   :  { %v3205_v33 = vpop.permute.xlu1 %1578 }
  0xe2   :  { %v3219_v50 = vpop.permute.xlu0 %1583 }
  0xe3   :  { %v3221_v51 = vpop.permute.xlu1 %1588 }
  0xf5   :  { %v489_v17 = vpop.f32.mrb[0].mxu0  ;;  %v729_v18 = vpop.f32.mrb[0].mxu1 }
  0xf6   :  { %v730_v19 = vadd.f32 %v729_v18, %v3189_v16  ;;  %v3192_v20 = vpop.f32.mrb[1].mxu0  ;;  %v3194_v21 = vpop.f32.mrb[1].mxu1  ;;  %v490_v24 = vadd.f32 %v489_v17, %v3189_v16 }
  0xf7   :  { %3708 = vst [vmem:[#allocation8_spill] sm:$0xff] %v3194_v21  ;;  %v493_v22 = vpop.f32.mrb[2].mxu0  ;;  %v733_v23 = vpop.f32.mrb[2].mxu1 }
  0xf8   :  { %v494_v25 = vadd.f32 %v493_v22, %v3189_v16  ;;  %v734_v26 = vadd.f32 %v733_v23, %v3189_v16  ;;  %v3199_v27 = vpop.f32.mrb[3].mxu0  ;;  %v3201_v28 = vpop.f32.mrb[3].mxu1 }
  0xf9   :  { %3709 = vst [vmem:[#allocation9_spill] sm:$0xff] %v3201_v28  ;;  %v3235_v22 = vpop.permute.xlu0 %1593  ;;  %v3237_v23 = vpop.permute.xlu1 %1598 }
  0xfa   :  { %v2212_v29 = vpack.c.bf16 %v494_v25, %v490_v24  ;;  %v2332_v30 = vpack.c.bf16 %v734_v26, %v730_v19 }
  0xfc   :  { %2213 = vst [vmem:[#allocation2] sm:$0xff] %v2212_v29   ;;  %2392 = vst [vmem:[#allocation2 + $0xc0] sm:$0xff] %v2332_v30  }
  0xfd   :  { %v499_v34 = vpop.f32.mrb[4].mxu0  ;;  %v739_v35 = vpop.f32.mrb[4].mxu1 }
  0xfe   :  { %v740_v36 = vadd.f32 %v739_v35, %v3189_v16  ;;  %v3208_v37 = vpop.f32.mrb[5].mxu0  ;;  %v3210_v39 = vpop.f32.mrb[5].mxu1  ;;  %v500_v42 = vadd.f32 %v499_v34, %v3189_v16 }
  0xff   :  { %3710 = vst [vmem:[#allocation10_spill] sm:$0xff] %v3210_v39  ;;  %v503_v40 = vpop.f32.mrb[6].mxu0  ;;  %v743_v41 = vpop.f32.mrb[6].mxu1 }
 0x100   :  { %v504_v43 = vadd.f32 %v503_v40, %v3189_v16  ;;  %v744_v44 = vadd.f32 %v743_v41, %v3189_v16  ;;  %v3215_v45 = vpop.f32.mrb[7].mxu0  ;;  %v3217_v47 = vpop.f32.mrb[7].mxu1 }
 0x101   :  { %3711 = vst [vmem:[#allocation11_spill] sm:$0xff] %v3217_v47 }
 0x102   :  { %v2217_v48 = vpack.c.bf16 %v504_v43, %v500_v42  ;;  %v2337_v49 = vpack.c.bf16 %v744_v44, %v740_v36 }
 0x104   :  { %2369 = vst [vmem:[#allocation2 + $0x8] sm:$0xff] %v2217_v48   ;;  %2393 = vst [vmem:[#allocation2 + $0xc8] sm:$0xff] %v2337_v49   ;;  %v3251_v49 = vpop.permute.xlu0 %1603 }
 0x105   :  { %v509_v53 = vpop.f32.mrb[8].mxu0  ;;  %v749_v54 = vpop.f32.mrb[8].mxu1 }
 0x106   :  { %v750_v55 = vadd.f32 %v749_v54, %v3189_v16  ;;  %v3224_v56 = vpop.f32.mrb[9].mxu0  ;;  %v3226_v57 = vpop.f32.mrb[9].mxu1  ;;  %v510_v61 = vadd.f32 %v509_v53, %v3189_v16 }
 0x107   :  { %3712 = vst [vmem:[#allocation12_spill] sm:$0xff] %v3226_v57  ;;  %v513_v58 = vpop.f32.mrb[10].mxu0  ;;  %v753_v59 = vpop.f32.mrb[10].mxu1 }
 0x108   :  { %v514_v62 = vadd.f32 %v513_v58, %v3189_v16  ;;  %v754_v8 = vadd.f32 %v753_v59, %v3189_v16  ;;  %v3231_v12 = vpop.f32.mrb[11].mxu0  ;;  %v3233_v17 = vpop.f32.mrb[11].mxu1 }
 0x109   :  { %3713 = vst [vmem:[#allocation13_spill] sm:$0xff] %v3233_v17  ;;  %v3253_v53 = vpop.permute.xlu1 %1608 }
 0x10a   :  { %v2222_v18 = vpack.c.bf16 %v514_v62, %v510_v61  ;;  %v2342_v19 = vpack.c.bf16 %v754_v8, %v750_v55 }
 0x10c   :  { %2370 = vst [vmem:[#allocation2 + $0x10] sm:$0xff] %v2222_v18   ;;  %2394 = vst [vmem:[#allocation2 + $0xd0] sm:$0xff] %v2342_v19  }
 0x10d   :  { %v519_v24 = vpop.f32.mrb[12].mxu0  ;;  %v759_v25 = vpop.f32.mrb[12].mxu1 }
 0x10e   :  { %v760_v26 = vadd.f32 %v759_v25, %v3189_v16  ;;  %v3240_v29 = vpop.f32.mrb[13].mxu0  ;;  %v3242_v30 = vpop.f32.mrb[13].mxu1  ;;  %v520_v36 = vadd.f32 %v519_v24, %v3189_v16 }
 0x10f   :  { %3714 = vst [vmem:[#allocation14_spill] sm:$0xff] %v3242_v30  ;;  %v523_v34 = vpop.f32.mrb[14].mxu0  ;;  %v763_v35 = vpop.f32.mrb[14].mxu1 }
 0x110   :  { %v524_v40 = vadd.f32 %v523_v34, %v3189_v16  ;;  %v764_v41 = vadd.f32 %v763_v35, %v3189_v16  ;;  %v3247_v42 = vpop.f32.mrb[15].mxu0  ;;  %v3249_v43 = vpop.f32.mrb[15].mxu1 }
 0x111   :  { %3715 = vst [vmem:[#allocation15_spill] sm:$0xff] %v3249_v43 }
 0x112   :  { %v2227_v44 = vpack.c.bf16 %v524_v40, %v520_v36  ;;  %v2347_v48 = vpack.c.bf16 %v764_v41, %v760_v26  ;;  %v3267_v36 = vpop.permute.xlu0 %1613  ;;  %v3269_v40 = vpop.permute.xlu1 %1618 }
 0x114   :  { %2371 = vst [vmem:[#allocation2 + $0x18] sm:$0xff] %v2227_v44   ;;  %2395 = vst [vmem:[#allocation2 + $0xd8] sm:$0xff] %v2347_v48  }
 0x115   :  { %v529_v54 = vpop.f32.mrb[16].mxu0  ;;  %v769_v55 = vpop.f32.mrb[16].mxu1 }
 0x116   :  { %v770_v58 = vadd.f32 %v769_v55, %v3189_v16  ;;  %v3256_v59 = vpop.f32.mrb[17].mxu0  ;;  %v3258_v61 = vpop.f32.mrb[17].mxu1  ;;  %v530_v18 = vadd.f32 %v529_v54, %v3189_v16 }
 0x117   :  { %3716 = vst [vmem:[#allocation16_spill] sm:$0xff] %v3258_v61  ;;  %v533_v62 = vpop.f32.mrb[18].mxu0  ;;  %v773_v8 = vpop.f32.mrb[18].mxu1 }
 0x118   :  { %v534_v19 = vadd.f32 %v533_v62, %v3189_v16  ;;  %v774_v24 = vadd.f32 %v773_v8, %v3189_v16  ;;  %v3263_v25 = vpop.f32.mrb[19].mxu0  ;;  %v3265_v26 = vpop.f32.mrb[19].mxu1 }
 0x119   :  { %3717 = vst [vmem:[#allocation17_spill] sm:$0xff] %v3265_v26  ;;  %v3283_v61 = vpop.permute.xlu0 %1623 }
 0x11a   :  { %v2232_v34 = vpack.c.bf16 %v534_v19, %v530_v18  ;;  %v2352_v35 = vpack.c.bf16 %v774_v24, %v770_v58 }
 0x11c   :  { %2372 = vst [vmem:[#allocation2 + $0x20] sm:$0xff] %v2232_v34   ;;  %2396 = vst [vmem:[#allocation2 + $0xe0] sm:$0xff] %v2352_v35  }
 0x11d   :  { %v539_v41 = vpop.f32.mrb[20].mxu0  ;;  %v779_v44 = vpop.f32.mrb[20].mxu1 }
 0x11e   :  { %v780_v48 = vadd.f32 %v779_v44, %v3189_v16  ;;  %v3272_v54 = vpop.f32.mrb[21].mxu0  ;;  %v3274_v55 = vpop.f32.mrb[21].mxu1  ;;  %v540_v26 = vadd.f32 %v539_v41, %v3189_v16 }
 0x11f   :  { %3718 = vst [vmem:[#allocation18_spill] sm:$0xff] %v3274_v55  ;;  %v543_v62 = vpop.f32.mrb[22].mxu0  ;;  %v783_v8 = vpop.f32.mrb[22].mxu1 }
 0x120   :  { %v544_v58 = vadd.f32 %v543_v62, %v3189_v16  ;;  %v784_v18 = vadd.f32 %v783_v8, %v3189_v16  ;;  %v3279_v19 = vpop.f32.mrb[23].mxu0  ;;  %v3281_v24 = vpop.f32.mrb[23].mxu1 }
 0x121   :  { %3719 = vst [vmem:[#allocation19_spill] sm:$0xff] %v3281_v24  ;;  %v3285_v44 = vpop.permute.xlu1 %1628  ;;  %v3300_v57 = vpop.permute.xlu0 %1633 }
 0x122   :  { %v2237_v34 = vpack.c.bf16 %v544_v58, %v540_v26  ;;  %v2357_v35 = vpack.c.bf16 %v784_v18, %v780_v48  ;;  %3720 = vst [vmem:[#allocation20_spill] sm:$0xff] %v3285_v44  ;;  %3723 = vst [vmem:[#allocation23_spill] sm:$0xff] %v3300_v57 }
 0x124   :  { %2373 = vst [vmem:[#allocation2 + $0x28] sm:$0xff] %v2237_v34   ;;  %2397 = vst [vmem:[#allocation2 + $0xe8] sm:$0xff] %v2357_v35  }
 0x125   :  { %v549_v55 = vpop.f32.mrb[24].mxu0  ;;  %v789_v43 = vpop.f32.mrb[24].mxu1 }
 0x126   :  { %v790_v41 = vadd.f32 %v789_v43, %v3189_v16  ;;  %v3288_v30 = vpop.f32.mrb[25].mxu0  ;;  %v3290_v62 = vpop.f32.mrb[25].mxu1  ;;  %v550_v24 = vadd.f32 %v549_v55, %v3189_v16  ;;  %v126_v43 = vsub.s32 1, %v3172_v9 }
 0x127   :  { %3721 = vst [vmem:[#allocation21_spill] sm:$0xff] %v3290_v62  ;;  %v553_v8 = vpop.f32.mrb[26].mxu0  ;;  %v793_v17 = vpop.f32.mrb[26].mxu1 }
 0x128   :  { %v554_v26 = vadd.f32 %v553_v8, %v3189_v16  ;;  %v794_v48 = vadd.f32 %v793_v17, %v3189_v16  ;;  %v3295_v58 = vpop.f32.mrb[27].mxu0  ;;  %v3297_v18 = vpop.f32.mrb[27].mxu1 }
 0x129   :  { %3722 = vst [vmem:[#allocation22_spill] sm:$0xff] %v3297_v18  ;;  %v3302_v47 = vpop.permute.xlu1 %1638  ;;  %v130_v18 = vsub.s32 2, %v3172_v9 }
 0x12a   :  { %v2242_v34 = vpack.c.bf16 %v554_v26, %v550_v24  ;;  %v2362_v35 = vpack.c.bf16 %v794_v48, %v790_v41  ;;  %3724 = vst [vmem:[#allocation24_spill] sm:$0xff] %v3302_v47  ;;  %v3311_v24 = vrot.slane %v3182_v13, %v126_v43 }
 0x12b   :  { %v3323_v43 = vrot.slane %v3182_v13, %v130_v18 }
 0x12c   :  { %2374 = vst [vmem:[#allocation2 + $0x30] sm:$0xff] %v2242_v34   ;;  %2398 = vst [vmem:[#allocation2 + $0xf0] sm:$0xff] %v2362_v35   ;;  %v492_v47 = vadd.f32 %v3192_v20, %v3311_v24 }
 0x12d   :  { %v559_v62 = vpop.f32.mrb[28].mxu0  ;;  %v799_v55 = vpop.f32.mrb[28].mxu1 }
 0x12e   :  { %v800_v8 = vadd.f32 %v799_v55, %v3189_v16  ;;  %v3305_v39 = vpop.f32.mrb[29].mxu0  ;;  %v3307_v17 = vpop.f32.mrb[29].mxu1  ;;  %v560_v48 = vadd.f32 %v559_v62, %v3189_v16  ;;  %v506_v62 = vadd.f32 %v3215_v45, %v3311_v24  ;;  %v1801_v45 = vmul.f32 %v3137_v63, %v492_v47 }
 0x12f   :  { %3725 = vst [vmem:[#allocation25_spill] sm:$0xff] %v3307_v17  ;;  %v563_v41 = vpop.f32.mrb[30].mxu0  ;;  %v803_v26 = vpop.f32.mrb[30].mxu1  ;;  %v502_v17 = vadd.f32 %v3208_v37, %v3311_v24  ;;  %v496_v37 = vadd.f32 %v3199_v27, %v3311_v24 }
 0x130   :  { %v564_v34 = vadd.f32 %v563_v41, %v3189_v16  ;;  %v804_v35 = vadd.f32 %v803_v26, %v3189_v16  ;;  %v3316_v28 = vpop.f32.mrb[31].mxu0  ;;  %v3318_v55 = vpop.f32.mrb[31].mxu1 }
 0x131   :  { %3726 = vst [vmem:[#allocation26_spill] sm:$0xff] %v3318_v55  ;;  %v3329_v41 = vpop.permute.xlu0 %1643  ;;  %v3331_v26 = vpop.permute.xlu1 %1648  ;;  %v1803_v13 = vmul.f32 %v3139_v0, %v502_v17  ;;  %v1802_v57 = vmul.f32 %v3141_v1, %v496_v37 }
 0x132   :  { %v2247_v21 = vpack.c.bf16 %v564_v34, %v560_v48  ;;  %v2367_v9 = vpack.c.bf16 %v804_v35, %v800_v8  ;;  %3727 = vst [vmem:[#allocation27_spill] sm:$0xff] %v3329_v41  ;;  %3728 = vst [vmem:[#allocation28_spill] sm:$0xff] %v3331_v26  ;;  %v1804_v35 = vmul.f32 %v3143_v4, %v506_v62 }
 0x133   :  { %v522_v4 = vadd.f32 %v3240_v29, %v3311_v24  ;;  %v516_v29 = vadd.f32 %v3231_v12, %v3311_v24 }
 0x134   :  { %2375 = vst [vmem:[#allocation2 + $0x38] sm:$0xff] %v2247_v21   ;;  %2399 = vst [vmem:[#allocation2 + $0xf8] sm:$0xff] %v2367_v9  }
 0x135   :  { %v569_v48 = vpop.f32.mrb[32].mxu0  ;;  %v2458_v8 = vpop.f32.mrb[32].mxu1 }
 0x136   :  { %v851_v18 = vadd.f32 %v2458_v8, %v3323_v43  ;;  %v3337_v34 = vpop.f32.mrb[33].mxu0  ;;  %v842_v20 = vpop.f32.mrb[33].mxu1  ;;  %v570_v26 = vadd.f32 %v569_v48, %v3189_v16  ;;  %v512_v48 = vadd.f32 %v3224_v56, %v3311_v24 }
 0x137   :  { %v843_v55 = vadd.f32 %v842_v20, %v3323_v43  ;;  %v573_v21 = vpop.f32.mrb[34].mxu0  ;;  %v2459_v9 = vpop.f32.mrb[34].mxu1 }
 0x138   :  { %v1867_v27 = vsub.f32 %v851_v18, %v1803_v13  ;;  %v574_v41 = vadd.f32 %v573_v21, %v3189_v16  ;;  %v854_v0 = vadd.f32 %v2459_v9, %v3323_v43  ;;  %v3345_v17 = vpop.f32.mrb[35].mxu0  ;;  %v845_v8 = vpop.f32.mrb[35].mxu1  ;;  %v526_v13 = vadd.f32 %v3247_v42, %v3311_v24 }
 0x139   :  { %v1865_v44 = vsub.f32 %v843_v55, %v1801_v45  ;;  %v846_v63 = vadd.f32 %v845_v8, %v3323_v43  ;;  %v3355_v20 = vpop.permute.xlu0 %1653  ;;  %v3357_v1 = vpop.permute.xlu1 %1658 }
 0x13a   :  { %1931 = vst [vmem:[#allocation4 + $0x10] sm:$0xff] %v1867_v27  ;;  %v2252_v47 = vpack.c.bf16 %v574_v41, %v570_v26  ;;  %v1868_v62 = vsub.f32 %v854_v0, %v1804_v35  ;;  %v1807_v26 = vmul.f32 %v3155_v46, %v522_v4 }
 0x13b   :  { %1929 = vst [vmem:[#allocation4] sm:$0xff] %v1865_v44  ;;  %v1866_v18 = vsub.f32 %v846_v63, %v1802_v57  ;;  %v1805_v57 = vmul.f32 %v3148_v31, %v512_v48  ;;  %v1808_v44 = vmul.f32 %v3157_v5, %v526_v13  ;;  %v1806_v63 = vmul.f32 %v3150_v38, %v516_v29 }
 0x13c   :  { %2376 = vst [vmem:[#allocation2 + $0x40] sm:$0xff] %v2252_v47   ;;  %1932 = vst [vmem:[#allocation4 + $0x18] sm:$0xff] %v1868_v62  ;;  %v542_v5 = vadd.f32 %v3272_v54, %v3311_v24  ;;  %v532_v48 = vadd.f32 %v3256_v59, %v3311_v24  ;;  %v546_v13 = vadd.f32 %v3279_v19, %v3311_v24 }
 0x13d   :  { %1930 = vst [vmem:[#allocation4 + $0x8] sm:$0xff] %v1866_v18  ;;  %v579_v55 = vpop.f32.mrb[36].mxu0  ;;  %v2462_v41 = vpop.f32.mrb[36].mxu1  ;;  %v536_v54 = vadd.f32 %v3263_v25, %v3311_v24 }
 0x13e   :  { %v867_v56 = vadd.f32 %v2462_v41, %v3323_v43  ;;  %v3363_v37 = vpop.f32.mrb[37].mxu0  ;;  %v858_v42 = vpop.f32.mrb[37].mxu1  ;;  %v580_v12 = vadd.f32 %v579_v55, %v3189_v16 }
 0x13f   :  { %v859_v45 = vadd.f32 %v858_v42, %v3323_v43  ;;  %v583_v35 = vpop.f32.mrb[38].mxu0  ;;  %v2463_v21 = vpop.f32.mrb[38].mxu1  ;;  %v1809_v42 = vmul.f32 %v3160_v52, %v532_v48 }
 0x140   :  { %v1871_v9 = vsub.f32 %v867_v56, %v1807_v26  ;;  %v584_v27 = vadd.f32 %v583_v35, %v3189_v16  ;;  %v870_v46 = vadd.f32 %v2463_v21, %v3323_v43  ;;  %v3371_v0 = vpop.f32.mrb[39].mxu0  ;;  %v861_v8 = vpop.f32.mrb[39].mxu1  ;;  %v1811_v26 = vmul.f32 %v3164_v6, %v542_v5 }
 0x141   :  { %v1869_v4 = vsub.f32 %v859_v45, %v1805_v57  ;;  %v862_v31 = vadd.f32 %v861_v8, %v3323_v43  ;;  %v3381_v55 = vpop.permute.xlu0 %1663  ;;  %v3383_v38 = vpop.permute.xlu1 %1668  ;;  %v1812_v57 = vmul.f32 %v3166_v7, %v546_v13  ;;  %v562_v7 = vadd.f32 %v3305_v39, %v3311_v24 }
 0x142   :  { %1935 = vst [vmem:[#allocation4 + $0x30] sm:$0xff] %v1871_v9  ;;  %v2257_v47 = vpack.c.bf16 %v584_v27, %v580_v12  ;;  %v1872_v62 = vsub.f32 %v870_v46, %v1808_v44  ;;  %v1810_v46 = vmul.f32 %v3162_v60, %v536_v54  ;;  %v566_v5 = vadd.f32 %v3316_v28, %v3311_v24 }
 0x143   :  { %1933 = vst [vmem:[#allocation4 + $0x20] sm:$0xff] %v1869_v4  ;;  %v1870_v18 = vsub.f32 %v862_v31, %v1806_v63  ;;  %v552_v31 = vadd.f32 %v3288_v30, %v3311_v24  ;;  %v556_v39 = vadd.f32 %v3295_v58, %v3311_v24 }
 0x144   :  { %2377 = vst [vmem:[#allocation2 + $0x48] sm:$0xff] %v2257_v47   ;;  %1936 = vst [vmem:[#allocation4 + $0x38] sm:$0xff] %v1872_v62 }
 0x145   :  { %1934 = vst [vmem:[#allocation4 + $0x28] sm:$0xff] %v1870_v18  ;;  %v589_v29 = vpop.f32.mrb[40].mxu0  ;;  %v2466_v41 = vpop.f32.mrb[40].mxu1  ;;  %v1815_v18 = vmul.f32 %v3174_v10, %v562_v7 }
 0x146   :  { %v883_v59 = vadd.f32 %v2466_v41, %v3323_v43  ;;  %v3389_v56 = vpop.f32.mrb[41].mxu0  ;;  %v874_v19 = vpop.f32.mrb[41].mxu1  ;;  %v590_v25 = vadd.f32 %v589_v29, %v3189_v16  ;;  %v1813_v29 = vmul.f32 %v3168_v3, %v552_v31  ;;  %v1816_v41 = vmul.f32 %v3176_v11, %v566_v5 }
 0x147   :  { %v875_v44 = vadd.f32 %v874_v19, %v3323_v43  ;;  %v593_v45 = vpop.f32.mrb[42].mxu0  ;;  %v2467_v35 = vpop.f32.mrb[42].mxu1  ;;  %v582_v11 = vadd.f32 %v3363_v37, %v3311_v24  ;;  %v576_v37 = vadd.f32 %v3345_v17, %v3311_v24 }
 0x148   :  { %v1875_v21 = vsub.f32 %v883_v59, %v1811_v26  ;;  %v594_v12 = vadd.f32 %v593_v45, %v3189_v16  ;;  %v886_v6 = vadd.f32 %v2467_v35, %v3323_v43  ;;  %v3397_v9 = vpop.f32.mrb[43].mxu0  ;;  %v877_v27 = vpop.f32.mrb[43].mxu1  ;;  %v1814_v35 = vmul.f32 %v3170_v2, %v556_v39 }
 0x149   :  { %v1873_v8 = vsub.f32 %v875_v44, %v1809_v42  ;;  %v878_v52 = vadd.f32 %v877_v27, %v3323_v43  ;;  %v3407_v62 = vpop.permute.xlu0 %1673  ;;  %v3409_v60 = vpop.permute.xlu1 %1678  ;;  %v586_v27 = vadd.f32 %v3371_v0, %v3311_v24 }
 0x14a   :  { %1939 = vst [vmem:[#allocation4 + $0x50] sm:$0xff] %v1875_v21  ;;  %v2262_v63 = vpack.c.bf16 %v594_v12, %v590_v25  ;;  %v1876_v4 = vsub.f32 %v886_v6, %v1812_v57  ;;  %v572_v6 = vadd.f32 %v3337_v34, %v3311_v24 }
 0x14b   :  { %1937 = vst [vmem:[#allocation4 + $0x40] sm:$0xff] %v1873_v8  ;;  %v1874_v47 = vsub.f32 %v878_v52, %v1810_v46  ;;  %v1820_v5 = vmul.f32 %v3205_v33, %v586_v27 }
 0x14c   :  { %2378 = vst [vmem:[#allocation2 + $0x50] sm:$0xff] %v2262_v63   ;;  %1940 = vst [vmem:[#allocation4 + $0x58] sm:$0xff] %v1876_v4  ;;  %v1819_v63 = vmul.f32 %v3203_v32, %v582_v11  ;;  %v1817_v31 = vmul.f32 %v3184_v14, %v572_v6 }
 0x14d   :  { %1938 = vst [vmem:[#allocation4 + $0x48] sm:$0xff] %v1874_v47  ;;  %v599_v48 = vpop.f32.mrb[44].mxu0  ;;  %v2470_v13 = vpop.f32.mrb[44].mxu1 }
 0x14e   :  { %v899_v30 = vadd.f32 %v2470_v13, %v3323_v43  ;;  %v601_v54 = vpop.f32.mrb[45].mxu0  ;;  %v890_v28 = vpop.f32.mrb[45].mxu1  ;;  %v600_v42 = vadd.f32 %v599_v48, %v3189_v16 }
 0x14f   :  { %v891_v26 = vadd.f32 %v890_v28, %v3323_v43  ;;  %v603_v59 = vpop.f32.mrb[46].mxu0  ;;  %v2471_v19 = vpop.f32.mrb[46].mxu1  ;;  %v602_v33 = vadd.f32 %v601_v54, %v3311_v24 }
 0x150   :  { %v1879_v58 = vsub.f32 %v899_v30, %v1815_v18  ;;  %v604_v57 = vadd.f32 %v603_v59, %v3189_v16  ;;  %v902_v44 = vadd.f32 %v2471_v19, %v3323_v43  ;;  %v605_v10 = vpop.f32.mrb[47].mxu0  ;;  %v893_v45 = vpop.f32.mrb[47].mxu1  ;;  %v592_v19 = vadd.f32 %v3389_v56, %v3311_v24 }
 0x151   :  { %v1877_v25 = vsub.f32 %v891_v26, %v1813_v29  ;;  %v894_v3 = vadd.f32 %v893_v45, %v3323_v43  ;;  %v3429_v8 = vpop.permute.xlu0 %1683  ;;  %v3431_v2 = vpop.permute.xlu1 %1688  ;;  %v1818_v29 = vmul.f32 %v3186_v15, %v576_v37  ;;  %v596_v15 = vadd.f32 %v3397_v9, %v3311_v24 }
 0x152   :  { %1943 = vst [vmem:[#allocation4 + $0x70] sm:$0xff] %v1879_v58  ;;  %v2267_v21 = vpack.c.bf16 %v604_v57, %v600_v42  ;;  %v1880_v12 = vsub.f32 %v902_v44, %v1816_v41  ;;  %v606_v42 = vadd.f32 %v605_v10, %v3311_v24 }
 0x153   :  { %1941 = vst [vmem:[#allocation4 + $0x60] sm:$0xff] %v1877_v25  ;;  %v1878_v46 = vsub.f32 %v894_v3, %v1814_v35  ;;  %v1823_v35 = vmul.f32 %v3235_v22, %v602_v33  ;;  %v1821_v3 = vmul.f32 %v3219_v50, %v592_v19 }
 0x154   :  { %2379 = vst [vmem:[#allocation2 + $0x58] sm:$0xff] %v2267_v21   ;;  %1944 = vst [vmem:[#allocation4 + $0x78] sm:$0xff] %v1880_v12  ;;  %v1824_v11 = vmul.f32 %v3237_v23, %v606_v42 }
 0x155   :  { %1942 = vst [vmem:[#allocation4 + $0x68] sm:$0xff] %v1878_v46  ;;  %v609_v52 = vpop.f32.mrb[48].mxu0  ;;  %v2474_v7 = vpop.f32.mrb[48].mxu1 }
 0x156   :  { %v915_v34 = vadd.f32 %v2474_v7, %v3323_v43  ;;  %v611_v4 = vpop.f32.mrb[49].mxu0  ;;  %v906_v0 = vpop.f32.mrb[49].mxu1  ;;  %v610_v13 = vadd.f32 %v609_v52, %v3189_v16  ;;  %v1822_v7 = vmul.f32 %v3221_v51, %v596_v15 }
 0x157   :  { %v907_v47 = vadd.f32 %v906_v0, %v3323_v43  ;;  %v613_v39 = vpop.f32.mrb[50].mxu0  ;;  %v2475_v48 = vpop.f32.mrb[50].mxu1 }
 0x158   :  { %v1883_v17 = vsub.f32 %v915_v34, %v1819_v63  ;;  %v614_v18 = vadd.f32 %v613_v39, %v3189_v16  ;;  %v918_v30 = vadd.f32 %v2475_v48, %v3323_v43  ;;  %v615_v32 = vpop.f32.mrb[51].mxu0  ;;  %v909_v28 = vpop.f32.mrb[51].mxu1 }
 0x159   :  { %v1881_v41 = vsub.f32 %v907_v47, %v1817_v31  ;;  %v910_v14 = vadd.f32 %v909_v28, %v3323_v43  ;;  %v3449_v57 = vpop.permute.xlu0 %1693  ;;  %v3451_v44 = vpop.permute.xlu1 %1698  ;;  %v612_v31 = vadd.f32 %v611_v4, %v3311_v24  ;;  %v616_v51 = vadd.f32 %v615_v32, %v3311_v24 }
 0x15a   :  { %1947 = vst [vmem:[#allocation4 + $0x90] sm:$0xff] %v1883_v17  ;;  %v2272_v26 = vpack.c.bf16 %v614_v18, %v610_v13  ;;  %v1884_v59 = vsub.f32 %v918_v30, %v1820_v5 }
 0x15b   :  { %1945 = vst [vmem:[#allocation4 + $0x80] sm:$0xff] %v1881_v41  ;;  %v1882_v58 = vsub.f32 %v910_v14, %v1818_v29  ;;  %v1825_v29 = vmul.f32 %v3251_v49, %v612_v31  ;;  %v1826_v15 = vmul.f32 %v3253_v53, %v616_v51 }
 0x15c   :  { %2380 = vst [vmem:[#allocation2 + $0x60] sm:$0xff] %v2272_v26   ;;  %1948 = vst [vmem:[#allocation4 + $0x98] sm:$0xff] %v1884_v59 }
 0x15d   :  { %1946 = vst [vmem:[#allocation4 + $0x88] sm:$0xff] %v1882_v58  ;;  %v619_v54 = vpop.f32.mrb[52].mxu0  ;;  %v2478_v45 = vpop.f32.mrb[52].mxu1 }
 0x15e   :  { %v931_v56 = vadd.f32 %v2478_v45, %v3323_v43  ;;  %v621_v25 = vpop.f32.mrb[53].mxu0  ;;  %v922_v10 = vpop.f32.mrb[53].mxu1  ;;  %v620_v27 = vadd.f32 %v619_v54, %v3189_v16 }
 0x15f   :  { %v923_v21 = vadd.f32 %v922_v10, %v3323_v43  ;;  %v623_v12 = vpop.f32.mrb[54].mxu0  ;;  %v2479_v6 = vpop.f32.mrb[54].mxu1  ;;  %v622_v23 = vadd.f32 %v621_v25, %v3311_v24 }
 0x160   :  { %v1887_v9 = vsub.f32 %v931_v56, %v1823_v35  ;;  %v624_v46 = vadd.f32 %v623_v12, %v3189_v16  ;;  %v934_v37 = vadd.f32 %v2479_v6, %v3323_v43  ;;  %v625_v22 = vpop.f32.mrb[55].mxu0  ;;  %v925_v52 = vpop.f32.mrb[55].mxu1 }
 0x161   :  { %v1885_v63 = vsub.f32 %v923_v21, %v1821_v3  ;;  %v926_v50 = vadd.f32 %v925_v52, %v3323_v43  ;;  %v626_v5 = vadd.f32 %v625_v22, %v3311_v24  ;;  %v3468_v39 = vpop.permute.xlu0 %1703  ;;  %v3470_v48 = vpop.permute.xlu1 %1708  ;;  %v1827_v18 = vmul.f32 %v3267_v36, %v622_v23  ;;  %v3729_v52 = vld [vmem:[#allocation20_spill] sm:$0xff] }
 0x162   :  { %1951 = vst [vmem:[#allocation4 + $0xb0] sm:$0xff] %v1887_v9  ;;  %v2277_v34 = vpack.c.bf16 %v624_v46, %v620_v27  ;;  %v1888_v0 = vsub.f32 %v934_v37, %v1824_v11 }
 0x163   :  { %1949 = vst [vmem:[#allocation4 + $0xa0] sm:$0xff] %v1885_v63  ;;  %v1886_v47 = vsub.f32 %v926_v50, %v1822_v7  ;;  %v1828_v41 = vmul.f32 %v3269_v40, %v626_v5 }
 0x164   :  { %2381 = vst [vmem:[#allocation2 + $0x68] sm:$0xff] %v2277_v34   ;;  %1952 = vst [vmem:[#allocation4 + $0xb8] sm:$0xff] %v1888_v0  ;;  %v3730_v0 = vld [vmem:[#allocation23_spill] sm:$0xff] }
 0x165   :  { %1950 = vst [vmem:[#allocation4 + $0xa8] sm:$0xff] %v1886_v47  ;;  %v629_v13 = vpop.f32.mrb[56].mxu0  ;;  %v2482_v17 = vpop.f32.mrb[56].mxu1 }
 0x166   :  { %v947_v30 = vadd.f32 %v2482_v17, %v3323_v43  ;;  %v631_v4 = vpop.f32.mrb[57].mxu0  ;;  %v938_v28 = vpop.f32.mrb[57].mxu1  ;;  %v630_v59 = vadd.f32 %v629_v13, %v3189_v16 }
 0x167   :  { %v939_v14 = vadd.f32 %v938_v28, %v3323_v43  ;;  %v633_v33 = vpop.f32.mrb[58].mxu0  ;;  %v2483_v26 = vpop.f32.mrb[58].mxu1  ;;  %v632_v35 = vadd.f32 %v631_v4, %v3311_v24 }
 0x168   :  { %v1891_v32 = vsub.f32 %v947_v30, %v1827_v18  ;;  %v634_v19 = vadd.f32 %v633_v33, %v3189_v16  ;;  %v950_v42 = vadd.f32 %v2483_v26, %v3323_v43  ;;  %v635_v36 = vpop.f32.mrb[59].mxu0  ;;  %v941_v58 = vpop.f32.mrb[59].mxu1  ;;  %v3731_v18 = vld [vmem:[#allocation24_spill] sm:$0xff] }
 0x169   :  { %v1889_v54 = vsub.f32 %v939_v14, %v1825_v29  ;;  %v942_v49 = vadd.f32 %v941_v58, %v3323_v43  ;;  %v3484_v25 = vpop.permute.xlu0 %1713  ;;  %v3486_v10 = vpop.permute.xlu1 %1718  ;;  %v636_v3 = vadd.f32 %v635_v36, %v3311_v24  ;;  %v1829_v6 = vmul.f32 %v3283_v61, %v632_v35 }
 0x16a   :  { %1955 = vst [vmem:[#allocation4 + $0xd0] sm:$0xff] %v1891_v32  ;;  %v2282_v40 = vpack.c.bf16 %v634_v19, %v630_v59  ;;  %v1892_v45 = vsub.f32 %v950_v42, %v1828_v41 }
 0x16b   :  { %1953 = vst [vmem:[#allocation4 + $0xc0] sm:$0xff] %v1889_v54  ;;  %v1890_v56 = vsub.f32 %v942_v49, %v1826_v15  ;;  %v1830_v7 = vmul.f32 %v3729_v52, %v636_v3 }
 0x16c   :  { %2382 = vst [vmem:[#allocation2 + $0x70] sm:$0xff] %v2282_v40   ;;  %1956 = vst [vmem:[#allocation4 + $0xd8] sm:$0xff] %v1892_v45  ;;  %v3732_v40 = vld [vmem:[#allocation27_spill] sm:$0xff] }
 0x16d   :  { %1954 = vst [vmem:[#allocation4 + $0xc8] sm:$0xff] %v1890_v56  ;;  %v639_v53 = vpop.f32.mrb[60].mxu0  ;;  %v2486_v11 = vpop.f32.mrb[60].mxu1 }
 0x16e   :  { %v641_v21 = vpop.f32.mrb[61].mxu0  ;;  %v954_v12 = vpop.f32.mrb[61].mxu1  ;;  %v963_v27 = vadd.f32 %v2486_v11, %v3323_v43  ;;  %v640_v63 = vadd.f32 %v639_v53, %v3189_v16  ;;  %v3733_v53 = vld [vmem:[#allocation28_spill] sm:$0xff] }
 0x16f   :  { %v642_v9 = vadd.f32 %v641_v21, %v3311_v24  ;;  %v955_v46 = vadd.f32 %v954_v12, %v3323_v43  ;;  %v643_v37 = vpop.f32.mrb[62].mxu0  ;;  %v2487_v22 = vpop.f32.mrb[62].mxu1 }
 0x170   :  { %v644_v50 = vadd.f32 %v643_v37, %v3189_v16  ;;  %v645_v23 = vpop.f32.mrb[63].mxu0  ;;  %v957_v34 = vpop.f32.mrb[63].mxu1  ;;  %v966_v17 = vadd.f32 %v2487_v22, %v3323_v43 }
 0x171   :  { %v1831_v31 = vmul.f32 %v3730_v0, %v642_v9  ;;  %v1893_v5 = vsub.f32 %v955_v46, %v1829_v6  ;;  %v646_v61 = vadd.f32 %v645_v23, %v3311_v24  ;;  %v958_v47 = vadd.f32 %v957_v34, %v3323_v43  ;;  %v3501_v28 = vpop.permute.xlu0 %1723  ;;  %v3503_v29 = vpop.permute.xlu1 %1728 }
 0x172   :  { %v2287_v51 = vpack.c.bf16 %v644_v50, %v640_v63 }
 0x173   :  { %v1895_v13 = vsub.f32 %v963_v27, %v1831_v31  ;;  %1957 = vst [vmem:[#allocation4 + $0xe0] sm:$0xff] %v1893_v5  ;;  %v1832_v30 = vmul.f32 %v3731_v18, %v646_v61  ;;  %v1894_v4 = vsub.f32 %v958_v47, %v1830_v7 }
 0x174   :  { %2383 = vst [vmem:[#allocation2 + $0x78] sm:$0xff] %v2287_v51  }
 0x175   :  { %1959 = vst [vmem:[#allocation4 + $0xf0] sm:$0xff] %v1895_v13  ;;  %v1896_v41 = vsub.f32 %v966_v17, %v1832_v30  ;;  %1958 = vst [vmem:[#allocation4 + $0xe8] sm:$0xff] %v1894_v4  ;;  %v649_v14 = vpop.f32.mrb[64].mxu0  ;;  %v2490_v33 = vpop.f32.mrb[64].mxu1 }
 0x176   :  { %v651_v26 = vpop.f32.mrb[65].mxu0  ;;  %v970_v59 = vpop.f32.mrb[65].mxu1  ;;  %v650_v58 = vadd.f32 %v649_v14, %v3189_v16  ;;  %v979_v31 = vadd.f32 %v2490_v33, %v3323_v43 }
 0x177   :  { %1960 = vst [vmem:[#allocation4 + $0xf8] sm:$0xff] %v1896_v41  ;;  %v652_v32 = vadd.f32 %v651_v26, %v3311_v24  ;;  %v971_v19 = vadd.f32 %v970_v59, %v3323_v43  ;;  %v653_v42 = vpop.f32.mrb[66].mxu0  ;;  %v2491_v36 = vpop.f32.mrb[66].mxu1 }
 0x178   :  { %v654_v15 = vadd.f32 %v653_v42, %v3189_v16  ;;  %v655_v54 = vpop.f32.mrb[67].mxu0  ;;  %v973_v49 = vpop.f32.mrb[67].mxu1  ;;  %v982_v51 = vadd.f32 %v2491_v36, %v3323_v43 }
 0x179   :  { %v1833_v45 = vmul.f32 %v3732_v40, %v652_v32  ;;  %v656_v35 = vadd.f32 %v655_v54, %v3311_v24  ;;  %v974_v21 = vadd.f32 %v973_v49, %v3323_v43  ;;  %v3513_v12 = vpop.permute.xlu0 %1733  ;;  %v3515_v6 = vpop.permute.xlu1 %1738 }
 0x17a   :  { %v2292_v56 = vpack.c.bf16 %v654_v15, %v650_v58 }
 0x17b   :  { %v1897_v3 = vsub.f32 %v971_v19, %v1833_v45  ;;  %v1834_v11 = vmul.f32 %v3733_v53, %v656_v35 }
 0x17c   :  { %2384 = vst [vmem:[#allocation2 + $0x80] sm:$0xff] %v2292_v56  }
 0x17d   :  { %1961 = vst [vmem:[#allocation4 + $0x100] sm:$0xff] %v1897_v3  ;;  %v1898_v27 = vsub.f32 %v974_v21, %v1834_v11  ;;  %v659_v9 = vpop.f32.mrb[68].mxu0  ;;  %v2494_v46 = vpop.f32.mrb[68].mxu1 }
 0x17e   :  { %v661_v37 = vpop.f32.mrb[69].mxu0  ;;  %v986_v22 = vpop.f32.mrb[69].mxu1  ;;  %v660_v50 = vadd.f32 %v659_v9, %v3189_v16 }
 0x17f   :  { %1962 = vst [vmem:[#allocation4 + $0x108] sm:$0xff] %v1898_v27  ;;  %v662_v52 = vadd.f32 %v661_v37, %v3311_v24  ;;  %v663_v7 = vpop.f32.mrb[70].mxu0  ;;  %v2495_v63 = vpop.f32.mrb[70].mxu1  ;;  %v987_v58 = vadd.f32 %v986_v22, %v3323_v43 }
 0x180   :  { %v664_v23 = vadd.f32 %v663_v7, %v3189_v16  ;;  %v665_v34 = vpop.f32.mrb[71].mxu0  ;;  %v989_v0 = vpop.f32.mrb[71].mxu1 }
 0x181   :  { %v1835_v5 = vmul.f32 %v3355_v20, %v662_v52  ;;  %v666_v61 = vadd.f32 %v665_v34, %v3311_v24  ;;  %v3525_v18 = vpop.permute.xlu0 %1743  ;;  %v3527_v30 = vpop.permute.xlu1 %1748  ;;  %v990_v40 = vadd.f32 %v989_v0, %v3323_v43  ;;  %v3735_v0 = vld [vmem:[#allocation9_spill] sm:$0xff] }
 0x182   :  { %v2297_v47 = vpack.c.bf16 %v664_v23, %v660_v50 }
 0x183   :  { %v1899_v13 = vsub.f32 %v979_v31, %v1835_v5  ;;  %v1836_v17 = vmul.f32 %v3357_v1, %v666_v61  ;;  %v736_v31 = vadd.f32 %v3735_v0, %v3311_v24  ;;  %v995_v5 = vadd.f32 %v2494_v46, %v3323_v43 }
 0x184   :  { %2385 = vst [vmem:[#allocation2 + $0x88] sm:$0xff] %v2297_v47  }
 0x185   :  { %1963 = vst [vmem:[#allocation4 + $0x110] sm:$0xff] %v1899_v13  ;;  %v1900_v4 = vsub.f32 %v982_v51, %v1836_v17  ;;  %v669_v41 = vpop.f32.mrb[72].mxu0  ;;  %v3529_v14 = vpop.f32.mrb[72].mxu1  ;;  %v3736_v51 = vld [vmem:[#allocation10_spill] sm:$0xff]  ;;  %v3737_v17 = vld [vmem:[#allocation11_spill] sm:$0xff]  ;;  %v1850_v46 = vmul.f32 %v3503_v29, %v736_v31 }
 0x186   :  { %v671_v33 = vpop.f32.mrb[73].mxu0  ;;  %v1002_v20 = vpop.f32.mrb[73].mxu1  ;;  %v670_v1 = vadd.f32 %v669_v41, %v3189_v16  ;;  %v742_v13 = vadd.f32 %v3736_v51, %v3311_v24 }
 0x187   :  { %1964 = vst [vmem:[#allocation4 + $0x118] sm:$0xff] %v1900_v4  ;;  %v672_v26 = vadd.f32 %v671_v33, %v3311_v24  ;;  %v673_v59 = vpop.f32.mrb[74].mxu0  ;;  %v3532_v32 = vpop.f32.mrb[74].mxu1  ;;  %v746_v4 = vadd.f32 %v3737_v17, %v3311_v24  ;;  %v998_v33 = vadd.f32 %v2495_v63, %v3323_v43  ;;  %v1003_v29 = vadd.f32 %v1002_v20, %v3323_v43 }
 0x188   :  { %v674_v19 = vadd.f32 %v673_v59, %v3189_v16  ;;  %v675_v42 = vpop.f32.mrb[75].mxu0  ;;  %v3536_v36 = vpop.f32.mrb[75].mxu1 }
 0x189   :  { %v1837_v15 = vmul.f32 %v3381_v55, %v672_v26  ;;  %v676_v54 = vadd.f32 %v675_v42, %v3311_v24  ;;  %v3543_v56 = vpop.permute.xlu0 %1753  ;;  %v3545_v3 = vpop.permute.xlu1 %1758  ;;  %v1852_v63 = vmul.f32 %v3515_v6, %v746_v4  ;;  %v1006_v4 = vadd.f32 %v3536_v36, %v3323_v43 }
 0x18a   :  { %v2302_v49 = vpack.c.bf16 %v674_v19, %v670_v1 }
 0x18b   :  { %v1901_v45 = vsub.f32 %v987_v58, %v1837_v15  ;;  %v1838_v35 = vmul.f32 %v3383_v38, %v676_v54  ;;  %v3734_v38 = vld [vmem:[#allocation8_spill] sm:$0xff]  ;;  %v1851_v54 = vmul.f32 %v3513_v12, %v742_v13 }
 0x18c   :  { %2386 = vst [vmem:[#allocation2 + $0x90] sm:$0xff] %v2302_v49   ;;  %v732_v52 = vadd.f32 %v3734_v38, %v3311_v24  ;;  %v3738_v49 = vld [vmem:[#allocation12_spill] sm:$0xff] }
 0x18d   :  { %1965 = vst [vmem:[#allocation4 + $0x120] sm:$0xff] %v1901_v45  ;;  %v1902_v53 = vsub.f32 %v990_v40, %v1838_v35  ;;  %v679_v11 = vpop.f32.mrb[76].mxu0  ;;  %v3547_v21 = vpop.f32.mrb[76].mxu1 }
 0x18e   :  { %v681_v27 = vpop.f32.mrb[77].mxu0  ;;  %v3549_v55 = vpop.f32.mrb[77].mxu1  ;;  %v680_v7 = vadd.f32 %v679_v11, %v3189_v16 }
 0x18f   :  { %1966 = vst [vmem:[#allocation4 + $0x128] sm:$0xff] %v1902_v53  ;;  %v682_v9 = vadd.f32 %v681_v27, %v3311_v24  ;;  %v683_v37 = vpop.f32.mrb[78].mxu0  ;;  %v3552_v22 = vpop.f32.mrb[78].mxu1  ;;  %v3739_v53 = vld [vmem:[#allocation13_spill] sm:$0xff] }
 0x190   :  { %v684_v50 = vadd.f32 %v683_v37, %v3189_v16  ;;  %v685_v23 = vpop.f32.mrb[79].mxu0  ;;  %v3558_v34 = vpop.f32.mrb[79].mxu1 }
 0x191   :  { %v1839_v61 = vmul.f32 %v3407_v62, %v682_v9  ;;  %v686_v47 = vadd.f32 %v685_v23, %v3311_v24  ;;  %v3571_v1 = vpop.permute.xlu0 %1763  ;;  %v3573_v19 = vpop.permute.xlu1 %1768  ;;  %v1849_v62 = vmul.f32 %v3501_v28, %v732_v52  ;;  %v756_v28 = vadd.f32 %v3739_v53, %v3311_v24 }
 0x192   :  { %v2307_v41 = vpack.c.bf16 %v684_v50, %v680_v7 }
 0x193   :  { %v1903_v26 = vsub.f32 %v995_v5, %v1839_v61  ;;  %v1840_v59 = vmul.f32 %v3409_v60, %v686_v47  ;;  %v752_v60 = vadd.f32 %v3738_v49, %v3311_v24  ;;  %v3740_v5 = vld [vmem:[#allocation14_spill] sm:$0xff]  ;;  %v3741_v47 = vld [vmem:[#allocation15_spill] sm:$0xff] }
 0x194   :  { %2387 = vst [vmem:[#allocation2 + $0x98] sm:$0xff] %v2307_v41   ;;  %v762_v61 = vadd.f32 %v3740_v5, %v3311_v24  ;;  %v766_v51 = vadd.f32 %v3741_v47, %v3311_v24 }
 0x195   :  { %1967 = vst [vmem:[#allocation4 + $0x130] sm:$0xff] %v1903_v26  ;;  %v1904_v42 = vsub.f32 %v998_v33, %v1840_v59  ;;  %v689_v58 = vpop.f32.mrb[80].mxu0  ;;  %v2506_v15 = vpop.f32.mrb[80].mxu1 }
 0x196   :  { %v1043_v40 = vadd.f32 %v2506_v15, %v3323_v43  ;;  %v691_v45 = vpop.f32.mrb[81].mxu0  ;;  %v1034_v35 = vpop.f32.mrb[81].mxu1  ;;  %v690_v6 = vadd.f32 %v689_v58, %v3189_v16  ;;  %v1855_v36 = vmul.f32 %v3543_v56, %v762_v61 }
 0x197   :  { %1968 = vst [vmem:[#allocation4 + $0x138] sm:$0xff] %v1904_v42  ;;  %v692_v11 = vadd.f32 %v691_v45, %v3311_v24  ;;  %v1035_v27 = vadd.f32 %v1034_v35, %v3323_v43  ;;  %v693_v12 = vpop.f32.mrb[82].mxu0  ;;  %v2507_v9 = vpop.f32.mrb[82].mxu1  ;;  %v1854_v42 = vmul.f32 %v3527_v30, %v756_v28  ;;  %v1011_v30 = vadd.f32 %v3529_v14, %v3323_v43 }
 0x198   :  { %v1915_v37 = vsub.f32 %v1043_v40, %v1851_v54  ;;  %v694_v38 = vadd.f32 %v693_v12, %v3189_v16  ;;  %v1046_v52 = vadd.f32 %v2507_v9, %v3323_v43  ;;  %v695_v7 = vpop.f32.mrb[83].mxu0  ;;  %v1037_v50 = vpop.f32.mrb[83].mxu1 }
 0x199   :  { %v1841_v23 = vmul.f32 %v3429_v8, %v692_v11  ;;  %v1913_v0 = vsub.f32 %v1035_v27, %v1849_v62  ;;  %v696_v20 = vadd.f32 %v695_v7, %v3311_v24  ;;  %v1038_v31 = vadd.f32 %v1037_v50, %v3323_v43  ;;  %v1774_v26 = vpop.permute.xlu0 %1773  ;;  %v1779_v59 = vpop.permute.xlu1 %1778  ;;  %v3745_v50 = vld [vmem:[#allocation19_spill] sm:$0xff] }
 0x19a   :  { %1979 = vst [vmem:[#allocation4 + $0x190] sm:$0xff] %v1915_v37  ;;  %v2312_v13 = vpack.c.bf16 %v694_v38, %v690_v6  ;;  %v1916_v17 = vsub.f32 %v1046_v52, %v1852_v63  ;;  %v1853_v62 = vmul.f32 %v3525_v18, %v752_v60  ;;  %v1856_v63 = vmul.f32 %v3545_v3, %v766_v51  ;;  %v3743_v18 = vld [vmem:[#allocation17_spill] sm:$0xff]  ;;  %v3744_v52 = vld [vmem:[#allocation18_spill] sm:$0xff] }
 0x19b   :  { %v1905_v41 = vsub.f32 %v1003_v29, %v1841_v23  ;;  %1977 = vst [vmem:[#allocation4 + $0x180] sm:$0xff] %v1913_v0  ;;  %v1842_v8 = vmul.f32 %v3431_v2, %v696_v20  ;;  %v1914_v33 = vsub.f32 %v1038_v31, %v1850_v46  ;;  %v3742_v2 = vld [vmem:[#allocation16_spill] sm:$0xff]  ;;  %v776_v60 = vadd.f32 %v3743_v18, %v3311_v24 }
 0x19c   :  { %2388 = vst [vmem:[#allocation2 + $0xa0] sm:$0xff] %v2312_v13   ;;  %1980 = vst [vmem:[#allocation4 + $0x198] sm:$0xff] %v1916_v17  ;;  %v772_v46 = vadd.f32 %v3742_v2, %v3311_v24  ;;  %v782_v7 = vadd.f32 %v3744_v52, %v3311_v24  ;;  %v786_v23 = vadd.f32 %v3745_v50, %v3311_v24 }
 0x19d   :  { %1969 = vst [vmem:[#allocation4 + $0x140] sm:$0xff] %v1905_v41  ;;  %v1906_v58 = vsub.f32 %v1006_v4, %v1842_v8  ;;  %1978 = vst [vmem:[#allocation4 + $0x188] sm:$0xff] %v1914_v33  ;;  %v699_v15 = vpop.f32.mrb[84].mxu0  ;;  %v2510_v54 = vpop.f32.mrb[84].mxu1  ;;  %v1014_v31 = vadd.f32 %v3532_v32, %v3323_v43  ;;  %v1858_v17 = vmul.f32 %v3573_v19, %v776_v60 }
 0x19e   :  { %v1059_v49 = vadd.f32 %v2510_v54, %v3323_v43  ;;  %v701_v40 = vpop.f32.mrb[85].mxu0  ;;  %v1050_v45 = vpop.f32.mrb[85].mxu1  ;;  %v700_v28 = vadd.f32 %v699_v15, %v3189_v16  ;;  %v1857_v13 = vmul.f32 %v3571_v1, %v772_v46  ;;  %v1859_v33 = vmul.f32 %v1774_v26, %v782_v7  ;;  %v3747_v54 = vld [vmem:[#allocation22_spill] sm:$0xff] }
 0x19f   :  { %1970 = vst [vmem:[#allocation4 + $0x148] sm:$0xff] %v1906_v58  ;;  %v702_v35 = vadd.f32 %v701_v40, %v3311_v24  ;;  %v1051_v56 = vadd.f32 %v1050_v45, %v3323_v43  ;;  %v703_v53 = vpop.f32.mrb[86].mxu0  ;;  %v2511_v3 = vpop.f32.mrb[86].mxu1  ;;  %v1860_v32 = vmul.f32 %v1779_v59, %v786_v23  ;;  %v1019_v1 = vadd.f32 %v3549_v55, %v3323_v43 }
 0x1a0   :  { %v1919_v29 = vsub.f32 %v1059_v49, %v1855_v36  ;;  %v704_v11 = vadd.f32 %v703_v53, %v3189_v16  ;;  %v1062_v27 = vadd.f32 %v2511_v3, %v3323_v43  ;;  %v705_v12 = vpop.f32.mrb[87].mxu0  ;;  %v1053_v9 = vpop.f32.mrb[87].mxu1  ;;  %v796_v36 = vadd.f32 %v3747_v54, %v3311_v24  ;;  %v3749_v3 = vld [vmem:[#allocation26_spill] sm:$0xff] }
 0x1a1   :  { %v1843_v6 = vmul.f32 %v3449_v57, %v702_v35  ;;  %v1917_v37 = vsub.f32 %v1051_v56, %v1853_v62  ;;  %v706_v14 = vadd.f32 %v705_v12, %v3311_v24  ;;  %v1054_v38 = vadd.f32 %v1053_v9, %v3323_v43  ;;  %v1784_v47 = vpop.permute.xlu0 %1783  ;;  %v1789_v51 = vpop.permute.xlu1 %1788  ;;  %v3746_v62 = vld [vmem:[#allocation21_spill] sm:$0xff] }
 0x1a2   :  { %1983 = vst [vmem:[#allocation4 + $0x1b0] sm:$0xff] %v1919_v29  ;;  %v2317_v0 = vpack.c.bf16 %v704_v11, %v700_v28  ;;  %v1920_v20 = vsub.f32 %v1062_v27, %v1856_v63  ;;  %v792_v58 = vadd.f32 %v3746_v62, %v3311_v24  ;;  %v3748_v56 = vld [vmem:[#allocation25_spill] sm:$0xff]  ;;  %v806_v28 = vadd.f32 %v3749_v3, %v3311_v24 }
 0x1a3   :  { %v1907_v5 = vsub.f32 %v1011_v30, %v1843_v6  ;;  %1981 = vst [vmem:[#allocation4 + $0x1a0] sm:$0xff] %v1917_v37  ;;  %v1844_v57 = vmul.f32 %v3451_v44, %v706_v14  ;;  %v1918_v61 = vsub.f32 %v1054_v38, %v1854_v42  ;;  %v802_v53 = vadd.f32 %v3748_v56, %v3311_v24 }
 0x1a4   :  { %2389 = vst [vmem:[#allocation2 + $0xa8] sm:$0xff] %v2317_v0   ;;  %1984 = vst [vmem:[#allocation4 + $0x1b8] sm:$0xff] %v1920_v20  ;;  %v1022_v12 = vadd.f32 %v3558_v34, %v3323_v43  ;;  %v1861_v7 = vmul.f32 %v1784_v47, %v792_v58  ;;  %v1862_v50 = vmul.f32 %v1789_v51, %v796_v36 }
 0x1a5   :  { %1971 = vst [vmem:[#allocation4 + $0x150] sm:$0xff] %v1907_v5  ;;  %v1908_v4 = vsub.f32 %v1014_v31, %v1844_v57  ;;  %1982 = vst [vmem:[#allocation4 + $0x1a8] sm:$0xff] %v1918_v61  ;;  %v709_v41 = vpop.f32.mrb[88].mxu0  ;;  %v2514_v8 = vpop.f32.mrb[88].mxu1 }
 0x1a6   :  { %v1075_v44 = vadd.f32 %v2514_v8, %v3323_v43  ;;  %v711_v42 = vpop.f32.mrb[89].mxu0  ;;  %v1066_v15 = vpop.f32.mrb[89].mxu1  ;;  %v710_v2 = vadd.f32 %v709_v41, %v3189_v16 }
 0x1a7   :  { %1972 = vst [vmem:[#allocation4 + $0x158] sm:$0xff] %v1908_v4  ;;  %v712_v19 = vadd.f32 %v711_v42, %v3311_v24  ;;  %v1067_v63 = vadd.f32 %v1066_v15, %v3323_v43  ;;  %v713_v26 = vpop.f32.mrb[90].mxu0  ;;  %v2515_v59 = vpop.f32.mrb[90].mxu1 }
 0x1a8   :  { %v1923_v46 = vsub.f32 %v1075_v44, %v1859_v33  ;;  %v714_v49 = vadd.f32 %v713_v26, %v3189_v16  ;;  %v1078_v40 = vadd.f32 %v2515_v59, %v3323_v43  ;;  %v715_v45 = vpop.f32.mrb[91].mxu0  ;;  %v1069_v18 = vpop.f32.mrb[91].mxu1  ;;  %v1030_v44 = vadd.f32 %v3552_v22, %v3323_v43 }
 0x1a9   :  { %v1845_v60 = vmul.f32 %v3468_v39, %v712_v19  ;;  %v1921_v30 = vsub.f32 %v1067_v63, %v1857_v13  ;;  %v716_v55 = vadd.f32 %v715_v45, %v3311_v24  ;;  %v1070_v35 = vadd.f32 %v1069_v18, %v3323_v43  ;;  %v1794_v27 = vpop.permute.xlu0 %1793  ;;  %v1799_v37 = vpop.permute.xlu1 %1798 }
 0x1aa   :  { %1987 = vst [vmem:[#allocation4 + $0x1d0] sm:$0xff] %v1923_v46  ;;  %v2322_v29 = vpack.c.bf16 %v714_v49, %v710_v2  ;;  %v1924_v11 = vsub.f32 %v1078_v40, %v1860_v32  ;;  %v1863_v23 = vmul.f32 %v1794_v27, %v802_v53  ;;  %v1864_v31 = vmul.f32 %v1799_v37, %v806_v28 }
 0x1ab   :  { %v1909_v9 = vsub.f32 %v1019_v1, %v1845_v60  ;;  %1985 = vst [vmem:[#allocation4 + $0x1c0] sm:$0xff] %v1921_v30  ;;  %v1846_v39 = vmul.f32 %v3470_v48, %v716_v55  ;;  %v1922_v6 = vsub.f32 %v1070_v35, %v1858_v17  ;;  %v1027_v48 = vadd.f32 %v3547_v21, %v3323_v43 }
 0x1ac   :  { %2390 = vst [vmem:[#allocation2 + $0xb0] sm:$0xff] %v2322_v29   ;;  %1988 = vst [vmem:[#allocation4 + $0x1d8] sm:$0xff] %v1924_v11 }
 0x1ad   :  { %1973 = vst [vmem:[#allocation4 + $0x160] sm:$0xff] %v1909_v9  ;;  %v1910_v14 = vsub.f32 %v1022_v12, %v1846_v39  ;;  %1986 = vst [vmem:[#allocation4 + $0x1c8] sm:$0xff] %v1922_v6  ;;  %v719_v38 = vpop.f32.mrb[92].mxu0  ;;  %v2518_v52 = vpop.f32.mrb[92].mxu1 }
 0x1ae   :  { %v1091_v0 = vadd.f32 %v2518_v52, %v3323_v43  ;;  %v721_v20 = vpop.f32.mrb[93].mxu0  ;;  %v1082_v34 = vpop.f32.mrb[93].mxu1  ;;  %v720_v47 = vadd.f32 %v719_v38, %v3189_v16 }
 0x1af   :  { %1974 = vst [vmem:[#allocation4 + $0x168] sm:$0xff] %v1910_v14  ;;  %v722_v5 = vadd.f32 %v721_v20, %v3311_v24  ;;  %v1083_v57 = vadd.f32 %v1082_v34, %v3323_v43  ;;  %v723_v61 = vpop.f32.mrb[94].mxu0  ;;  %v2519_v13 = vpop.f32.mrb[94].mxu1 }
 0x1b0   :  { %v1927_v51 = vsub.f32 %v1091_v0, %v1863_v23  ;;  %v724_v17 = vadd.f32 %v723_v61, %v3189_v16  ;;  %v1094_v4 = vadd.f32 %v2519_v13, %v3323_v43  ;;  %v725_v41 = vpop.f32.mrb[95].mxu0  ;;  %v1085_v8 = vpop.f32.mrb[95].mxu1 }
 0x1b1   :  { %v1847_v21 = vmul.f32 %v3484_v25, %v722_v5  ;;  %v1925_v33 = vsub.f32 %v1083_v57, %v1861_v7  ;;  %v726_v32 = vadd.f32 %v725_v41, %v3311_v24  ;;  %v1086_v62 = vadd.f32 %v1085_v8, %v3323_v43 }
 0x1b2   :  { %1991 = vst [vmem:[#allocation4 + $0x1f0] sm:$0xff] %v1927_v51  ;;  %v2327_v16 = vpack.c.bf16 %v724_v17, %v720_v47  ;;  %v1928_v58 = vsub.f32 %v1094_v4, %v1864_v31 }
 0x1b3   :  { %v1911_v42 = vsub.f32 %v1027_v48, %v1847_v21  ;;  %1989 = vst [vmem:[#allocation4 + $0x1e0] sm:$0xff] %v1925_v33  ;;  %v1848_v25 = vmul.f32 %v3486_v10, %v726_v32  ;;  %v1926_v15 = vsub.f32 %v1086_v62, %v1862_v50 }
 0x1b4   :  { %2391 = vst [vmem:[#allocation2 + $0xb8] sm:$0xff] %v2327_v16   ;;  %1992 = vst [vmem:[#allocation4 + $0x1f8] sm:$0xff] %v1928_v58 }
 0x1b5   :  { %1975 = vst [vmem:[#allocation4 + $0x170] sm:$0xff] %v1911_v42  ;;  %v1912_v24 = vsub.f32 %v1030_v44, %v1848_v25  ;;  %1990 = vst [vmem:[#allocation4 + $0x1e8] sm:$0xff] %v1926_v15 }
 0x1b6   :  { %2620 = shalt.err (!%p2617_p4)
}
 0x1b7   :  { %s2621_s9 = scalar_lea.hbm %s3706_s4, 4096 }
 0x1b8   :  { %p2622_p5 = scmp.ne.s32.totalorder %s3706_s4, %s2621_s9  ;;  %p2625_p6 = scmp.lt.u32.totalorder %s2621_s9, %s3706_s4 }
 0x1ba   :  { %p2627_p7 = pnand %p2625_p6, %p2622_p5 }
 0x1bc   :  { %2630 = shalt.err (!%p2627_p7)
}
 0x1bd   :  { %s2660_s12 = smov 64   ;;  %s2661_s13 = smov 4   ;;  %1976 = vst [vmem:[#allocation4 + $0x178] sm:$0xff] %v1912_v24 }
 0x1be   :  { %2004 = dma.vmem_to_hbm [thread:$0]  %s3661_s28, 4096, %s3706_s4, [#allocation3], %s2660_s12, %s2660_s12, %s2661_s13  }
 0x1bf   :  { %s2631_s16 = scalar_lea.vmem %s3666_s30, 8192  ;;  %p2636_p9 = scmp.lt.s32.totalorder %s3666_s30, %s3666_s30 }
 0x1c0   :  { %p2632_p8 = scmp.ne.s32.totalorder %s3666_s30, %s2631_s16  ;;  %p2637_p10 = scmp.lt.s32.totalorder %s2631_s16, %s2631_s16 }
 0x1c2   :  { %p2638_p11 = por %p2637_p10, %p2636_p9 }
 0x1c4   :  { %p2639_p12 = pnand %p2638_p11, %p2632_p8 }
 0x1c6   :  { %2642 = shalt.err (!%p2639_p12)
}
 0x1c7   :  { %s2643_s19 = scalar_lea.hbm %s3707_s5, 8192 }
 0x1c8   :  { %p2644_p13 = scmp.ne.s32.totalorder %s3707_s5, %s2643_s19  ;;  %p2647_p0 = scmp.lt.u32.totalorder %s2643_s19, %s3707_s5 }
 0x1ca   :  { %p2649_p1 = pnand %p2647_p0, %p2644_p13 }
 0x1cc   :  { %2652 = shalt.err (!%p2649_p1)
}
 0x1cd   :  { %s2662_s4 = smov 128   ;;  %s2663_s24 = smov 8  }
 0x1ce   :  { %2016 = dma.vmem_to_hbm [thread:$0]  %s3666_s30, 8192, %s3707_s5, [#allocation5], %s2662_s4, %s2662_s4, %s2663_s24  }
 0x1cf   :  { %2653 = dma.done.wait [#allocation3], 4096  }
 0x1d0   :  { %2654 = vsyncadd [#allocation3], 4294963200 }
 0x1d1   :  { %2655 = dma.done.wait [#allocation5], 8192  }
 0x1d2   :  { %2656 = vsyncadd [#allocation5], 4294959104 }
 0x1d3   :  { %2023 = vsyncpa [#allocation3], 1 }
 0x1d4   :  { %2024 = vsyncpa [#allocation5], 1 }

</bundles_post_ra>
